<compile_context>
chip_gen: v6e
topology: v6e:2x2x1
jax: 0.10.0
libtpu: 0.0.40
codegen_flags: <defaults>
</compile_context>

<pallas_src>
import functools
import math

import jax
import jax.numpy as jnp
from jax.experimental import pallas as pl
from jax.experimental.pallas import tpu as pltpu

EPS = 1e-5
GELU_C = math.sqrt(2.0 / math.pi)
NEG_INF = -1e30


# ------------------------- hardware-dependent settings -------------------------

@functools.lru_cache(maxsize=None)
def _vmem_limit_bytes():
    cap = 128 * 1024 * 1024
    try:
        info = pltpu.get_tpu_info()
        cap = int(getattr(info, "vmem_capacity_bytes", cap))
    except Exception:
        pass
    # ~2/3 of physical VMEM: ~42 MiB on v7x (64 MiB), ~85 MiB on v5e/v6e (128 MiB)
    return max(32 * 1024 * 1024, min((cap * 2) // 3, 100 * 1024 * 1024))


@functools.lru_cache(maxsize=None)
def _q_tile_cap():
    try:
        kind = jax.devices()[0].device_kind.lower()
    except Exception:
        kind = ""
    # v5e's MXU is 128 rows wide -> M=128 already saturates it; v6e/v7x want 256.
    if "v5e" in kind or ("v5" in kind and "lite" in kind):
        return 128
    return 256


def _pick_q_tile(T, cap):
    """Largest multiple-of-8 divisor of T not exceeding cap (or full T)."""
    if T <= cap:
        return T                      # full-extent tile is always legal
    best = None
    for tq in range(8, cap + 1, 8):
        if T % tq == 0:
            best = tq
    return best if best is not None else T


def _pick_row_tile(M, cap=256):
    if M <= cap:
        return M
    best = None
    for tm in range(8, cap + 1, 8):
        if M % tm == 0:
            best = tm
    return best if best is not None else M


def _pick_v_tile(Vp, cap=2048):
    """Vp is a multiple of 128; pick a wide lane-dense vocab tile."""
    if Vp <= cap:
        return Vp
    best = 128
    for tv in range(128, cap + 1, 128):
        if Vp % tv == 0:
            best = tv
    return best


def _weight_spec(shape):
    """Resident (constant index_map) weight block, single-buffered if supported."""
    nd = len(shape)
    index_map = lambda *_: (0,) * nd
    try:
        return pl.BlockSpec(shape, index_map, pipeline_mode=pl.Buffered(1))
    except TypeError:
        return pl.BlockSpec(shape, index_map)


# ----------------------------- in-kernel helpers -----------------------------

def _layer_norm(h, scale, shift):
    # matches torch: mean / biased var along last dim; rsqrt -> EUP
    mean = jnp.mean(h, axis=-1, keepdims=True)
    c = h - mean
    var = jnp.mean(c * c, axis=-1, keepdims=True)
    return c * jax.lax.rsqrt(var + EPS) * scale + shift


def _gelu(x):
    # tanh-approx GELU, exactly as in the reference module (f32)
    return 0.5 * x * (1.0 + jnp.tanh(GELU_C * (x + 0.044715 * x * x * x)))


def _split_heads(m, num_heads, head_dim):
    # (rows, D) -> (H, rows, hd): one reshape + one transpose (single relayout)
    rows = m.shape[0]
    return jnp.transpose(m.reshape(rows, num_heads, head_dim), (1, 0, 2))


def _merge_heads(m):
    # (H, rows, hd) -> (rows, D)
    h, rows, hd = m.shape
    return jnp.transpose(m, (1, 0, 2)).reshape(rows, h * hd)


# ------------------------------ Pallas kernels -------------------------------

def transformer_block_kernel(num_heads, q_tile,
                             x_ref,
                             ln1_s_ref, ln1_b_ref,
                             wq_ref, wk_ref, wv_ref, wo_ref, bo_ref,
                             ln2_s_ref, ln2_b_ref,
                             w1_ref, b1_ref, w2_ref, b2_ref,
                             out_ref,
                             k_scratch, v_scratch):
    """One transformer block for one (batch row, query-tile) grid point.

    Grid = (B, T // tq); the q axis is 'arbitrary' so K/V (computed from the full
    row) are built once per batch row under @pl.when(q == 0) and reused for every
    query tile of that row.
    """
    qi = pl.program_id(1)
    T, D = x_ref.shape[1], x_ref.shape[2]
    H = num_heads
    hd = D // H
    tq = q_tile
    scale = 1.0 / math.sqrt(hd)
    q0 = pl.multiple_of(qi * tq, tq)          # global row offset of this query tile

    # ---- K/V for the whole row: computed once per batch row into VMEM scratch ----
    @pl.when(qi == 0)
    def _():
        hkv = _layer_norm(x_ref[0], ln1_s_ref[...], ln1_b_ref[...]).astype(jnp.bfloat16)
        k2 = jnp.dot(hkv, wk_ref[...], preferred_element_type=jnp.float32)    # (T, D)
        v2 = jnp.dot(hkv, wv_ref[...], preferred_element_type=jnp.float32)    # (T, D)
        k_scratch[...] = _split_heads(k2, H, hd).astype(jnp.bfloat16)         # (H, T, hd)
        v_scratch[...] = _split_heads(v2, H, hd).astype(jnp.bfloat16)         # (H, T, hd)

    # ---- query tile sliced out of the resident full row (no duplicate input) ----
    xq = x_ref[0, pl.ds(q0, tq), :]           # (tq, D) f32

    hq = _layer_norm(xq, ln1_s_ref[...], ln1_b_ref[...]).astype(jnp.bfloat16)
    q2 = jnp.dot(hq, wq_ref[...], preferred_element_type=jnp.float32) * scale  # (tq, D)
    q3 = _split_heads(q2, H, hd).astype(jnp.bfloat16)                          # (H, tq, hd)

    k3 = k_scratch[...]                       # (H, T, hd) bf16
    v3 = v_scratch[...]                       # (H, T, hd) bf16

    # ---- batched causal attention over heads (single softmax codegen) ----
    # TODO(synk): flash-style KV-block tiling with online softmax + pl.when skip of
    # fully-masked KV blocks (currently every query tile attends to the full T).
    s = jnp.einsum('hqd,hkd->hqk', q3, k3,
                   preferred_element_type=jnp.float32)                         # (H, tq, T)
    row = jax.lax.broadcasted_iota(jnp.int32, (1, tq, T), 1) + q0
    col = jax.lax.broadcasted_iota(jnp.int32, (1, tq, T), 2)
    s = jnp.where(col <= row, s, NEG_INF)
    s = s - jnp.max(s, axis=-1, keepdims=True)
    e = jnp.exp(s)
    p = e * pl.reciprocal(jnp.sum(e, axis=-1, keepdims=True), approx=True)
    ctx = jnp.einsum('hqk,hkd->hqd', p.astype(jnp.bfloat16), v3,
                     preferred_element_type=jnp.float32)                       # (H, tq, hd)

    # ---- output projection: concat heads back to (tq, D), single full-K matmul ----
    ctx2 = _merge_heads(ctx).astype(jnp.bfloat16)                              # (tq, D)
    attn = jnp.dot(ctx2, wo_ref[...], preferred_element_type=jnp.float32) + bo_ref[...]

    x1 = xq + attn                            # residual (dropout p=0 -> identity)

    # ---- pre-norm + feed-forward (Linear -> GELU -> Linear), bf16 matmuls ----
    h2 = _layer_norm(x1, ln2_s_ref[...], ln2_b_ref[...]).astype(jnp.bfloat16)
    ff = jnp.dot(h2, w1_ref[...], preferred_element_type=jnp.float32) + b1_ref[...]
    ff = _gelu(ff).astype(jnp.bfloat16)
    ff = jnp.dot(ff, w2_ref[...], preferred_element_type=jnp.float32) + b2_ref[...]

    out_ref[0] = x1 + ff                      # residual (dropout p=0 -> identity)


def final_head_kernel(x_ref, ln_s_ref, ln_b_ref, wout_ref, out_ref, h_scratch):
    """Final LayerNorm (hoisted, computed once per row tile) + one vocab slab."""
    @pl.when(pl.program_id(1) == 0)
    def _():
        h_scratch[...] = _layer_norm(x_ref[...], ln_s_ref[...],
                                     ln_b_ref[...]).astype(jnp.bfloat16)
    out_ref[...] = jnp.dot(h_scratch[...], wout_ref[...],
                           preferred_element_type=jnp.float32)


# ------------------------------- host wrappers --------------------------------

def transformer_block(x, p, num_heads):
    B, T, D = x.shape
    H4 = 4 * D
    hd = D // num_heads
    tq = _pick_q_tile(T, _q_tile_cap())
    n_q = T // tq
    kernel = functools.partial(transformer_block_kernel, num_heads, tq)
    return pl.pallas_call(
        kernel,
        out_shape=jax.ShapeDtypeStruct((B, T, D), jnp.float32),
        grid=(B, n_q),
        in_specs=[
            pl.BlockSpec((1, T, D), lambda b, q: (b, 0, 0)),      # full row (resident per b)
            _weight_spec((1, D)), _weight_spec((1, D)),           # ln1 scale/shift
            _weight_spec((D, D)), _weight_spec((D, D)), _weight_spec((D, D)),  # Wq,Wk,Wv
            _weight_spec((D, D)),                                 # Wo (D, D), full-K proj
            _weight_spec((1, D)),                                 # bo
            _weight_spec((1, D)), _weight_spec((1, D)),           # ln2 scale/shift
            _weight_spec((D, H4)), _weight_spec((1, H4)),         # W1, b1
            _weight_spec((H4, D)), _weight_spec((1, D)),          # W2, b2
        ],
        out_specs=pl.BlockSpec((1, tq, D), lambda b, q: (b, q, 0)),
        scratch_shapes=[
            pltpu.VMEM((num_heads, T, hd), jnp.bfloat16),         # K (head-split)
            pltpu.VMEM((num_heads, T, hd), jnp.bfloat16),         # V (head-split)
        ],
        compiler_params=pltpu.CompilerParams(
            dimension_semantics=("parallel", "arbitrary"),
            vmem_limit_bytes=_vmem_limit_bytes()),
    )(x, p['ln1_s'], p['ln1_b'], p['wq'], p['wk'], p['wv'], p['wo'], p['bo'],
      p['ln2_s'], p['ln2_b'], p['w1'], p['b1'], p['w2'], p['b2'])


def final_head(x, ln_s, ln_b, wout):
    B, T, D = x.shape
    V = wout.shape[1]
    Vp = ((V + 127) // 128) * 128             # pad vocab to lane-dense multiple of 128
    if Vp != V:
        wout = jnp.pad(wout, ((0, 0), (0, Vp - V)))
    tv = _pick_v_tile(Vp)
    M = B * T                                 # fold batch into the row axis
    tm = _pick_row_tile(M)
    x2 = x.reshape(M, D)
    out = pl.pallas_call(
        final_head_kernel,
        out_shape=jax.ShapeDtypeStruct((M, Vp), jnp.float32),
        grid=(M // tm, Vp // tv),
        in_specs=[
            pl.BlockSpec((tm, D), lambda i, j: (i, 0)),           # rows (resident per i)
            _weight_spec((1, D)), _weight_spec((1, D)),
            pl.BlockSpec((D, tv), lambda i, j: (0, j)),           # vocab slab (pipelined)
        ],
        out_specs=pl.BlockSpec((tm, tv), lambda i, j: (i, j)),
        scratch_shapes=[pltpu.VMEM((tm, D), jnp.bfloat16)],       # normalized rows
        compiler_params=pltpu.CompilerParams(
            dimension_semantics=("parallel", "arbitrary"),
            vmem_limit_bytes=_vmem_limit_bytes()),
    )(x2, ln_s, ln_b, wout)
    return out[:, :V].reshape(B, T, V)


def gpt_forward(in_idx, params, cfg):
    B, T = in_idx.shape
    # Embedding gather + positional add is glue (plain JAX, data-dependent gather).
    x = params['tok_emb'][in_idx] + params['pos_emb'][:T][None, :, :]
    # drop_emb: p=0 -> identity
    for blk in params['blocks']:
        x = transformer_block(x, blk, cfg['n_heads'])
    # TODO(synk): cross-pallas_call weight prefetch for layer l+1 while layer l
    # computes (P10 semaphore/VMEM-ref futures) not implemented.
    logits = final_head(x, params['final_ln_s'], params['final_ln_b'],
                        params['out_head'])
    return logits


# ------------------------------ parameter init --------------------------------

def init_params(key, cfg):
    D, V, C, L = (cfg['emb_dim'], cfg['vocab_size'], cfg['context_length'],
                  cfg['n_layers'])
    keys = iter(jax.random.split(key, 3 + 6 * L))
    std = 0.02

    def w(shape, dtype=jnp.float32):
        return (jax.random.normal(next(keys), shape, jnp.float32) * std).astype(dtype)

    params = {
        'tok_emb': w((V, D)),
        'pos_emb': w((C, D)),
        'blocks': [],
        'final_ln_s': jnp.ones((1, D), jnp.float32),
        'final_ln_b': jnp.zeros((1, D), jnp.float32),
        'out_head': w((D, V), jnp.bfloat16),
    }
    for _ in range(L):
        params['blocks'].append({
            'ln1_s': jnp.ones((1, D), jnp.float32),
            'ln1_b': jnp.zeros((1, D), jnp.float32),
            'wq': w((D, D), jnp.bfloat16),
            'wk': w((D, D), jnp.bfloat16),
            'wv': w((D, D), jnp.bfloat16),
            'wo': w((D, D), jnp.bfloat16),      # applied to head-concatenated context
            'bo': jnp.zeros((1, D), jnp.float32),
            'ln2_s': jnp.ones((1, D), jnp.float32),
            'ln2_b': jnp.zeros((1, D), jnp.float32),
            'w1': w((D, 4 * D), jnp.bfloat16),
            'b1': jnp.zeros((1, 4 * D), jnp.float32),
            'w2': w((4 * D, D), jnp.bfloat16),
            'b2': jnp.zeros((1, D), jnp.float32),
        })
    return params


# ------------------------------------ main -------------------------------------

if __name__ == "__main__":
    cfg = {
        'vocab_size': 256,       # multiple of 128 -> lane-dense vocab slabs
        'context_length': 16,
        'emb_dim': 128,          # lane-aligned embedding dim
        'n_heads': 4,
        'n_layers': 2,
        'drop_rate': 0.0,        # dropout is identity (eval / p=0)
        'qkv_bias': False,       # TODO(synk): qkv_bias=True / dropout>0 not supported
    }

    key = jax.random.PRNGKey(0)
    k_params, k_idx = jax.random.split(key)
    params = init_params(k_params, cfg)

    B, T = 2, 16
    in_idx = jax.random.randint(k_idx, (B, T), 0, cfg['vocab_size'], dtype=jnp.int32)

    logits = gpt_forward(in_idx, params, cfg)
    jax.block_until_ready(logits)
    assert logits.shape == (B, T, cfg['vocab_size'])
    assert bool(jnp.all(jnp.isfinite(logits)))
    print("KERNEL_OK")
</pallas_src>

<mosaic_0001>
module attributes {stable_mosaic.version = 11 : i64} {
  func.func @transformer_block_kernel(%arg0: i32, %arg1: i32, %arg2: memref<1x16x128xf32, #tpu.memory_space<vmem>>, %arg3: memref<1x128xf32, #tpu.memory_space<vmem>>, %arg4: memref<1x128xf32, #tpu.memory_space<vmem>>, %arg5: memref<128x128xbf16, #tpu.memory_space<vmem>>, %arg6: memref<128x128xbf16, #tpu.memory_space<vmem>>, %arg7: memref<128x128xbf16, #tpu.memory_space<vmem>>, %arg8: memref<128x128xbf16, #tpu.memory_space<vmem>>, %arg9: memref<1x128xf32, #tpu.memory_space<vmem>>, %arg10: memref<1x128xf32, #tpu.memory_space<vmem>>, %arg11: memref<1x128xf32, #tpu.memory_space<vmem>>, %arg12: memref<128x512xbf16, #tpu.memory_space<vmem>>, %arg13: memref<1x512xf32, #tpu.memory_space<vmem>>, %arg14: memref<512x128xbf16, #tpu.memory_space<vmem>>, %arg15: memref<1x128xf32, #tpu.memory_space<vmem>>, %arg16: memref<1x16x128xf32, #tpu.memory_space<vmem>>, %arg17: memref<4x16x32xbf16, #tpu.memory_space<vmem>>, %arg18: memref<4x16x32xbf16, #tpu.memory_space<vmem>>) attributes {dimension_semantics = [#tpu.dimension_semantics<parallel>, #tpu.dimension_semantics<arbitrary>], iteration_bounds = array<i64: 2, 1>, scalar_prefetch = 0 : i64, scratch_operands = 2 : i64, tpu.core_type = #tpu.core_type<tc>, window_params = [{transform_indices = @transform_0, window_bounds = array<i64: 1, 16, 128>}, {pipeline_mode = #tpu.pipeline_mode<synchronous>, transform_indices = @transform_1, window_bounds = array<i64: 1, 128>}, {pipeline_mode = #tpu.pipeline_mode<synchronous>, transform_indices = @transform_2, window_bounds = array<i64: 1, 128>}, {pipeline_mode = #tpu.pipeline_mode<synchronous>, transform_indices = @transform_3, window_bounds = array<i64: 128, 128>}, {pipeline_mode = #tpu.pipeline_mode<synchronous>, transform_indices = @transform_4, window_bounds = array<i64: 128, 128>}, {pipeline_mode = #tpu.pipeline_mode<synchronous>, transform_indices = @transform_5, window_bounds = array<i64: 128, 128>}, {pipeline_mode = #tpu.pipeline_mode<synchronous>, transform_indices = @transform_6, window_bounds = array<i64: 128, 128>}, {pipeline_mode = #tpu.pipeline_mode<synchronous>, transform_indices = @transform_7, window_bounds = array<i64: 1, 128>}, {pipeline_mode = #tpu.pipeline_mode<synchronous>, transform_indices = @transform_8, window_bounds = array<i64: 1, 128>}, {pipeline_mode = #tpu.pipeline_mode<synchronous>, transform_indices = @transform_9, window_bounds = array<i64: 1, 128>}, {pipeline_mode = #tpu.pipeline_mode<synchronous>, transform_indices = @transform_10, window_bounds = array<i64: 128, 512>}, {pipeline_mode = #tpu.pipeline_mode<synchronous>, transform_indices = @transform_11, window_bounds = array<i64: 1, 512>}, {pipeline_mode = #tpu.pipeline_mode<synchronous>, transform_indices = @transform_12, window_bounds = array<i64: 512, 128>}, {pipeline_mode = #tpu.pipeline_mode<synchronous>, transform_indices = @transform_13, window_bounds = array<i64: 1, 128>}, {transform_indices = @transform_14, window_bounds = array<i64: 1, 16, 128>}]} {
    %c16_i32 = arith.constant 16 : i32
    %0 = arith.muli %arg1, %c16_i32 : i32
    %1 = tpu.assume_multiple %0, 16 : i32
    %c0_i32 = arith.constant 0 : i32
    %2 = arith.cmpi eq, %arg1, %c0_i32 : i32
    %3 = arith.extui %2 : i1 to i32
    %c0_i32_0 = arith.constant 0 : i32
    %4 = arith.cmpi ne, %3, %c0_i32_0 : i32
    scf.if %4 {
      %c0_56 = arith.constant 0 : index
      %c0_57 = arith.constant 0 : index
      %c0_58 = arith.constant 0 : index
      %122 = vector.load %arg2[%c0_56, %c0_57, %c0_58] : memref<1x16x128xf32, #tpu.memory_space<vmem>>, vector<1x16x128xf32>
      %123 = vector.shape_cast %122 : vector<1x16x128xf32> to vector<16x128xf32>
      %c0_59 = arith.constant 0 : index
      %c0_60 = arith.constant 0 : index
      %124 = vector.load %arg3[%c0_59, %c0_60] : memref<1x128xf32, #tpu.memory_space<vmem>>, vector<1x128xf32>
      %c0_61 = arith.constant 0 : index
      %c0_62 = arith.constant 0 : index
      %125 = vector.load %arg4[%c0_61, %c0_62] : memref<1x128xf32, #tpu.memory_space<vmem>>, vector<1x128xf32>
      %cst_63 = arith.constant dense<0.000000e+00> : vector<16xf32>
      %126 = vector.multi_reduction <add>, %123, %cst_63 [1] : vector<16x128xf32> to vector<16xf32>
      %127 = vector.shape_cast %126 : vector<16xf32> to vector<16x1xf32>
      %cst_64 = arith.constant 1.280000e+02 : f32
      %128 = vector.broadcast %cst_64 : f32 to vector<16x1xf32>
      %129 = arith.divf %127, %128 : vector<16x1xf32>
      %130 = vector.broadcast %129 : vector<16x1xf32> to vector<16x128xf32>
      %131 = arith.subf %123, %130 : vector<16x128xf32>
      %132 = arith.mulf %131, %131 : vector<16x128xf32>
      %cst_65 = arith.constant dense<0.000000e+00> : vector<16xf32>
      %133 = vector.multi_reduction <add>, %132, %cst_65 [1] : vector<16x128xf32> to vector<16xf32>
      %134 = vector.shape_cast %133 : vector<16xf32> to vector<16x1xf32>
      %cst_66 = arith.constant 1.280000e+02 : f32
      %135 = vector.broadcast %cst_66 : f32 to vector<16x1xf32>
      %136 = arith.divf %134, %135 : vector<16x1xf32>
      %cst_67 = arith.constant 9.99999974E-6 : f32
      %137 = vector.broadcast %cst_67 : f32 to vector<16x1xf32>
      %138 = arith.addf %136, %137 : vector<16x1xf32>
      %139 = math.rsqrt %138 : vector<16x1xf32>
      %140 = vector.broadcast %139 : vector<16x1xf32> to vector<16x128xf32>
      %141 = arith.mulf %131, %140 : vector<16x128xf32>
      %142 = vector.broadcast %124 : vector<1x128xf32> to vector<16x128xf32>
      %143 = arith.mulf %141, %142 : vector<16x128xf32>
      %144 = vector.broadcast %125 : vector<1x128xf32> to vector<16x128xf32>
      %145 = arith.addf %143, %144 : vector<16x128xf32>
      %146 = arith.truncf %145 : vector<16x128xf32> to vector<16x128xbf16>
      %c0_68 = arith.constant 0 : index
      %c0_69 = arith.constant 0 : index
      %147 = vector.load %arg6[%c0_68, %c0_69] : memref<128x128xbf16, #tpu.memory_space<vmem>>, vector<128x128xbf16>
      %cst_70 = arith.constant dense<0.000000e+00> : vector<16x128xf32>
      %148 = tpu.matmul %146, %147, %cst_70 {dimension_numbers = #tpu.dot_dimension_numbers<[1], [0], [0], [1], [0, 0, 1, 1], [], []>} : vector<16x128xbf16>, vector<128x128xbf16>, vector<16x128xf32> -> vector<16x128xf32>
      %c0_71 = arith.constant 0 : index
      %c0_72 = arith.constant 0 : index
      %149 = vector.load %arg7[%c0_71, %c0_72] : memref<128x128xbf16, #tpu.memory_space<vmem>>, vector<128x128xbf16>
      %cst_73 = arith.constant dense<0.000000e+00> : vector<16x128xf32>
      %150 = tpu.matmul %146, %149, %cst_73 {dimension_numbers = #tpu.dot_dimension_numbers<[1], [0], [0], [1], [0, 0, 1, 1], [], []>} : vector<16x128xbf16>, vector<128x128xbf16>, vector<16x128xf32> -> vector<16x128xf32>
      %151 = vector.shape_cast %148 : vector<16x128xf32> to vector<16x4x32xf32>
      %152 = tpu.transpose %151, [1, 0, 2] : vector<16x4x32xf32> -> vector<4x16x32xf32>
      %153 = arith.truncf %152 : vector<4x16x32xf32> to vector<4x16x32xbf16>
      %c0_74 = arith.constant 0 : index
      %c0_75 = arith.constant 0 : index
      %c0_76 = arith.constant 0 : index
      %154 = vector.load %arg17[%c0_74, %c0_75, %c0_76] : memref<4x16x32xbf16, #tpu.memory_space<vmem>>, vector<4x16x32xbf16>
      tpu.vector_store %arg17[%c0_74, %c0_75, %c0_76], %153 {strides = array<i32>} : memref<4x16x32xbf16, #tpu.memory_space<vmem>>, vector<4x16x32xbf16>,
      %155 = vector.shape_cast %150 : vector<16x128xf32> to vector<16x4x32xf32>
      %156 = tpu.transpose %155, [1, 0, 2] : vector<16x4x32xf32> -> vector<4x16x32xf32>
      %157 = arith.truncf %156 : vector<4x16x32xf32> to vector<4x16x32xbf16>
      %c0_77 = arith.constant 0 : index
      %c0_78 = arith.constant 0 : index
      %c0_79 = arith.constant 0 : index
      %158 = vector.load %arg18[%c0_77, %c0_78, %c0_79] : memref<4x16x32xbf16, #tpu.memory_space<vmem>>, vector<4x16x32xbf16>
      tpu.vector_store %arg18[%c0_77, %c0_78, %c0_79], %157 {strides = array<i32>} : memref<4x16x32xbf16, #tpu.memory_space<vmem>>, vector<4x16x32xbf16>,
    } else {
    }
    %c0 = arith.constant 0 : index
    %5 = arith.index_cast %1 : i32 to index
    %c0_1 = arith.constant 0 : index
    %6 = vector.load %arg2[%c0, %5, %c0_1] : memref<1x16x128xf32, #tpu.memory_space<vmem>>, vector<1x16x128xf32>
    %7 = vector.shape_cast %6 : vector<1x16x128xf32> to vector<16x128xf32>
    %c0_2 = arith.constant 0 : index
    %c0_3 = arith.constant 0 : index
    %8 = vector.load %arg3[%c0_2, %c0_3] : memref<1x128xf32, #tpu.memory_space<vmem>>, vector<1x128xf32>
    %c0_4 = arith.constant 0 : index
    %c0_5 = arith.constant 0 : index
    %9 = vector.load %arg4[%c0_4, %c0_5] : memref<1x128xf32, #tpu.memory_space<vmem>>, vector<1x128xf32>
    %cst = arith.constant dense<0.000000e+00> : vector<16xf32>
    %10 = vector.multi_reduction <add>, %7, %cst [1] : vector<16x128xf32> to vector<16xf32>
    %11 = vector.shape_cast %10 : vector<16xf32> to vector<16x1xf32>
    %cst_6 = arith.constant 1.280000e+02 : f32
    %12 = vector.broadcast %cst_6 : f32 to vector<16x1xf32>
    %13 = arith.divf %11, %12 : vector<16x1xf32>
    %14 = vector.broadcast %13 : vector<16x1xf32> to vector<16x128xf32>
    %15 = arith.subf %7, %14 : vector<16x128xf32>
    %16 = arith.mulf %15, %15 : vector<16x128xf32>
    %cst_7 = arith.constant dense<0.000000e+00> : vector<16xf32>
    %17 = vector.multi_reduction <add>, %16, %cst_7 [1] : vector<16x128xf32> to vector<16xf32>
    %18 = vector.shape_cast %17 : vector<16xf32> to vector<16x1xf32>
    %cst_8 = arith.constant 1.280000e+02 : f32
    %19 = vector.broadcast %cst_8 : f32 to vector<16x1xf32>
    %20 = arith.divf %18, %19 : vector<16x1xf32>
    %cst_9 = arith.constant 9.99999974E-6 : f32
    %21 = vector.broadcast %cst_9 : f32 to vector<16x1xf32>
    %22 = arith.addf %20, %21 : vector<16x1xf32>
    %23 = math.rsqrt %22 : vector<16x1xf32>
    %24 = vector.broadcast %23 : vector<16x1xf32> to vector<16x128xf32>
    %25 = arith.mulf %15, %24 : vector<16x128xf32>
    %26 = vector.broadcast %8 : vector<1x128xf32> to vector<16x128xf32>
    %27 = arith.mulf %25, %26 : vector<16x128xf32>
    %28 = vector.broadcast %9 : vector<1x128xf32> to vector<16x128xf32>
    %29 = arith.addf %27, %28 : vector<16x128xf32>
    %30 = arith.truncf %29 : vector<16x128xf32> to vector<16x128xbf16>
    %c0_10 = arith.constant 0 : index
    %c0_11 = arith.constant 0 : index
    %31 = vector.load %arg5[%c0_10, %c0_11] : memref<128x128xbf16, #tpu.memory_space<vmem>>, vector<128x128xbf16>
    %cst_12 = arith.constant dense<0.000000e+00> : vector<16x128xf32>
    %32 = tpu.matmul %30, %31, %cst_12 {dimension_numbers = #tpu.dot_dimension_numbers<[1], [0], [0], [1], [0, 0, 1, 1], [], []>} : vector<16x128xbf16>, vector<128x128xbf16>, vector<16x128xf32> -> vector<16x128xf32>
    %cst_13 = arith.constant 0.176776692 : f32
    %33 = vector.broadcast %cst_13 : f32 to vector<16x128xf32>
    %34 = arith.mulf %32, %33 : vector<16x128xf32>
    %35 = vector.shape_cast %34 : vector<16x128xf32> to vector<16x4x32xf32>
    %36 = tpu.transpose %35, [1, 0, 2] : vector<16x4x32xf32> -> vector<4x16x32xf32>
    %37 = arith.truncf %36 : vector<4x16x32xf32> to vector<4x16x32xbf16>
    %c0_14 = arith.constant 0 : index
    %c0_15 = arith.constant 0 : index
    %c0_16 = arith.constant 0 : index
    %38 = vector.load %arg17[%c0_14, %c0_15, %c0_16] : memref<4x16x32xbf16, #tpu.memory_space<vmem>>, vector<4x16x32xbf16>
    %c0_17 = arith.constant 0 : index
    %c0_18 = arith.constant 0 : index
    %c0_19 = arith.constant 0 : index
    %39 = vector.load %arg18[%c0_17, %c0_18, %c0_19] : memref<4x16x32xbf16, #tpu.memory_space<vmem>>, vector<4x16x32xbf16>
    "tpu.trace_start"() <{level = 10 : i32, message = "hqd,hkd->hqk"}> : () -> ()
    %cst_20 = arith.constant dense<0.000000e+00> : vector<4x16x16xf32>
    %40 = tpu.matmul %37, %38, %cst_20 {dimension_numbers = #tpu.dot_dimension_numbers<[2], [2], [1], [1], [0, 0, 0, 1, 1, 1], [0], [0]>} : vector<4x16x32xbf16>, vector<4x16x32xbf16>, vector<4x16x16xf32> -> vector<4x16x16xf32>
    "tpu.trace_stop"() : () -> ()
    %41 = tpu.iota {dimensions = array<i32: 1>} : vector<1x16x16xi32>
    %42 = vector.broadcast %1 : i32 to vector<1x16x16xi32>
    %43 = arith.addi %41, %42 : vector<1x16x16xi32>
    %44 = tpu.iota {dimensions = array<i32: 2>} : vector<1x16x16xi32>
    %45 = arith.cmpi sle, %44, %43 : vector<1x16x16xi32>
    %cst_21 = arith.constant -1.000000e+30 : f32
    %46 = vector.shape_cast %45 : vector<1x16x16xi1> to vector<1x16x16xi1>
    %47 = vector.broadcast %46 : vector<1x16x16xi1> to vector<4x16x16xi1>
    %48 = vector.broadcast %cst_21 : f32 to vector<4x16x16xf32>
    %49 = arith.select %47, %40, %48 : vector<4x16x16xi1>, vector<4x16x16xf32>
    %cst_22 = arith.constant dense<0xFF800000> : vector<4x16xf32>
    %50 = vector.multi_reduction <maximumf>, %49, %cst_22 [2] : vector<4x16x16xf32> to vector<4x16xf32>
    %51 = vector.shape_cast %50 : vector<4x16xf32> to vector<4x16x1xf32>
    %52 = vector.broadcast %51 : vector<4x16x1xf32> to vector<4x16x16xf32>
    %53 = arith.subf %49, %52 : vector<4x16x16xf32>
    %54 = math.exp %53 : vector<4x16x16xf32>
    %cst_23 = arith.constant dense<0.000000e+00> : vector<4x16xf32>
    %55 = vector.multi_reduction <add>, %54, %cst_23 [2] : vector<4x16x16xf32> to vector<4x16xf32>
    %56 = vector.shape_cast %55 : vector<4x16xf32> to vector<4x16x1xf32>
    %57 = tpu.reciprocal %56 {approx = true} : vector<4x16x1xf32> -> vector<4x16x1xf32>
    %58 = vector.broadcast %57 : vector<4x16x1xf32> to vector<4x16x16xf32>
    %59 = arith.mulf %54, %58 : vector<4x16x16xf32>
    %60 = arith.truncf %59 : vector<4x16x16xf32> to vector<4x16x16xbf16>
    "tpu.trace_start"() <{level = 10 : i32, message = "hqk,hkd->hqd"}> : () -> ()
    %cst_24 = arith.constant dense<0.000000e+00> : vector<4x16x32xf32>
    %61 = tpu.matmul %60, %39, %cst_24 {dimension_numbers = #tpu.dot_dimension_numbers<[2], [1], [1], [2], [0, 0, 0, 1, 1, 2], [0], [0]>} : vector<4x16x16xbf16>, vector<4x16x32xbf16>, vector<4x16x32xf32> -> vector<4x16x32xf32>
    "tpu.trace_stop"() : () -> ()
    %62 = tpu.transpose %61, [1, 0, 2] : vector<4x16x32xf32> -> vector<16x4x32xf32>
    %63 = vector.shape_cast %62 : vector<16x4x32xf32> to vector<16x128xf32>
    %64 = arith.truncf %63 : vector<16x128xf32> to vector<16x128xbf16>
    %c0_25 = arith.constant 0 : index
    %c0_26 = arith.constant 0 : index
    %65 = vector.load %arg8[%c0_25, %c0_26] : memref<128x128xbf16, #tpu.memory_space<vmem>>, vector<128x128xbf16>
    %cst_27 = arith.constant dense<0.000000e+00> : vector<16x128xf32>
    %66 = tpu.matmul %64, %65, %cst_27 {dimension_numbers = #tpu.dot_dimension_numbers<[1], [0], [0], [1], [0, 0, 1, 1], [], []>} : vector<16x128xbf16>, vector<128x128xbf16>, vector<16x128xf32> -> vector<16x128xf32>
    %c0_28 = arith.constant 0 : index
    %c0_29 = arith.constant 0 : index
    %67 = vector.load %arg9[%c0_28, %c0_29] : memref<1x128xf32, #tpu.memory_space<vmem>>, vector<1x128xf32>
    %68 = vector.broadcast %67 : vector<1x128xf32> to vector<16x128xf32>
    %69 = arith.addf %66, %68 : vector<16x128xf32>
    %70 = arith.addf %7, %69 : vector<16x128xf32>
    %c0_30 = arith.constant 0 : index
    %c0_31 = arith.constant 0 : index
    %71 = vector.load %arg10[%c0_30, %c0_31] : memref<1x128xf32, #tpu.memory_space<vmem>>, vector<1x128xf32>
    %c0_32 = arith.constant 0 : index
    %c0_33 = arith.constant 0 : index
    %72 = vector.load %arg11[%c0_32, %c0_33] : memref<1x128xf32, #tpu.memory_space<vmem>>, vector<1x128xf32>
    %cst_34 = arith.constant dense<0.000000e+00> : vector<16xf32>
    %73 = vector.multi_reduction <add>, %70, %cst_34 [1] : vector<16x128xf32> to vector<16xf32>
    %74 = vector.shape_cast %73 : vector<16xf32> to vector<16x1xf32>
    %cst_35 = arith.constant 1.280000e+02 : f32
    %75 = vector.broadcast %cst_35 : f32 to vector<16x1xf32>
    %76 = arith.divf %74, %75 : vector<16x1xf32>
    %77 = vector.broadcast %76 : vector<16x1xf32> to vector<16x128xf32>
    %78 = arith.subf %70, %77 : vector<16x128xf32>
    %79 = arith.mulf %78, %78 : vector<16x128xf32>
    %cst_36 = arith.constant dense<0.000000e+00> : vector<16xf32>
    %80 = vector.multi_reduction <add>, %79, %cst_36 [1] : vector<16x128xf32> to vector<16xf32>
    %81 = vector.shape_cast %80 : vector<16xf32> to vector<16x1xf32>
    %cst_37 = arith.constant 1.280000e+02 : f32
    %82 = vector.broadcast %cst_37 : f32 to vector<16x1xf32>
    %83 = arith.divf %81, %82 : vector<16x1xf32>
    %cst_38 = arith.constant 9.99999974E-6 : f32
    %84 = vector.broadcast %cst_38 : f32 to vector<16x1xf32>
    %85 = arith.addf %83, %84 : vector<16x1xf32>
    %86 = math.rsqrt %85 : vector<16x1xf32>
    %87 = vector.broadcast %86 : vector<16x1xf32> to vector<16x128xf32>
    %88 = arith.mulf %78, %87 : vector<16x128xf32>
    %89 = vector.broadcast %71 : vector<1x128xf32> to vector<16x128xf32>
    %90 = arith.mulf %88, %89 : vector<16x128xf32>
    %91 = vector.broadcast %72 : vector<1x128xf32> to vector<16x128xf32>
    %92 = arith.addf %90, %91 : vector<16x128xf32>
    %93 = arith.truncf %92 : vector<16x128xf32> to vector<16x128xbf16>
    %c0_39 = arith.constant 0 : index
    %c0_40 = arith.constant 0 : index
    %94 = vector.load %arg12[%c0_39, %c0_40] : memref<128x512xbf16, #tpu.memory_space<vmem>>, vector<128x512xbf16>
    %cst_41 = arith.constant dense<0.000000e+00> : vector<16x512xf32>
    %95 = tpu.matmul %93, %94, %cst_41 {dimension_numbers = #tpu.dot_dimension_numbers<[1], [0], [0], [1], [0, 0, 1, 1], [], []>} : vector<16x128xbf16>, vector<128x512xbf16>, vector<16x512xf32> -> vector<16x512xf32>
    %c0_42 = arith.constant 0 : index
    %c0_43 = arith.constant 0 : index
    %96 = vector.load %arg13[%c0_42, %c0_43] : memref<1x512xf32, #tpu.memory_space<vmem>>, vector<1x512xf32>
    %97 = vector.broadcast %96 : vector<1x512xf32> to vector<16x512xf32>
    %98 = arith.addf %95, %97 : vector<16x512xf32>
    %cst_44 = arith.constant 5.000000e-01 : f32
    %99 = vector.broadcast %cst_44 : f32 to vector<16x512xf32>
    %100 = arith.mulf %99, %98 : vector<16x512xf32>
    %cst_45 = arith.constant 4.471500e-02 : f32
    %101 = vector.broadcast %cst_45 : f32 to vector<16x512xf32>
    %102 = arith.mulf %101, %98 : vector<16x512xf32>
    %103 = arith.mulf %102, %98 : vector<16x512xf32>
    %104 = arith.mulf %103, %98 : vector<16x512xf32>
    %105 = arith.addf %98, %104 : vector<16x512xf32>
    %cst_46 = arith.constant 0.797884583 : f32
    %106 = vector.broadcast %cst_46 : f32 to vector<16x512xf32>
    %107 = arith.mulf %106, %105 : vector<16x512xf32>
    %108 = math.tanh %107 : vector<16x512xf32>
    %cst_47 = arith.constant 1.000000e+00 : f32
    %109 = vector.broadcast %cst_47 : f32 to vector<16x512xf32>
    %110 = arith.addf %109, %108 : vector<16x512xf32>
    %111 = arith.mulf %100, %110 : vector<16x512xf32>
    %112 = arith.truncf %111 : vector<16x512xf32> to vector<16x512xbf16>
    %c0_48 = arith.constant 0 : index
    %c0_49 = arith.constant 0 : index
    %113 = vector.load %arg14[%c0_48, %c0_49] : memref<512x128xbf16, #tpu.memory_space<vmem>>, vector<512x128xbf16>
    %cst_50 = arith.constant dense<0.000000e+00> : vector<16x128xf32>
    %114 = tpu.matmul %112, %113, %cst_50 {dimension_numbers = #tpu.dot_dimension_numbers<[1], [0], [0], [1], [0, 0, 1, 1], [], []>} : vector<16x512xbf16>, vector<512x128xbf16>, vector<16x128xf32> -> vector<16x128xf32>
    %c0_51 = arith.constant 0 : index
    %c0_52 = arith.constant 0 : index
    %115 = vector.load %arg15[%c0_51, %c0_52] : memref<1x128xf32, #tpu.memory_space<vmem>>, vector<1x128xf32>
    %116 = vector.broadcast %115 : vector<1x128xf32> to vector<16x128xf32>
    %117 = arith.addf %114, %116 : vector<16x128xf32>
    %118 = arith.addf %70, %117 : vector<16x128xf32>
    %c0_53 = arith.constant 0 : index
    %c0_54 = arith.constant 0 : index
    %c0_55 = arith.constant 0 : index
    %119 = vector.load %arg16[%c0_53, %c0_54, %c0_55] : memref<1x16x128xf32, #tpu.memory_space<vmem>>, vector<1x16x128xf32>
    %120 = vector.shape_cast %119 : vector<1x16x128xf32> to vector<16x128xf32>
    %121 = vector.shape_cast %118 : vector<16x128xf32> to vector<1x16x128xf32>
    tpu.vector_store %arg16[%c0_53, %c0_54, %c0_55], %121 {strides = array<i32>} : memref<1x16x128xf32, #tpu.memory_space<vmem>>, vector<1x16x128xf32>,
    return
  }
  func.func @transform_0(%arg0: i32, %arg1: i32) -> (i32, i32, i32) {
    %c0_i32 = arith.constant 0 : i32
    %c0_i32_0 = arith.constant 0 : i32
    %c0_i32_1 = arith.constant 0 : i32
    return %arg0, %c0_i32, %c0_i32_0 : i32, i32, i32
  }
  func.func @transform_1(%arg0: i32, %arg1: i32) -> (i32, i32) {
    %c0_i32 = arith.constant 0 : i32
    %c0_i32_0 = arith.constant 0 : i32
    %c0_i32_1 = arith.constant 0 : i32
    return %c0_i32, %c0_i32_0 : i32, i32
  }
  func.func @transform_2(%arg0: i32, %arg1: i32) -> (i32, i32) {
    %c0_i32 = arith.constant 0 : i32
    %c0_i32_0 = arith.constant 0 : i32
    %c0_i32_1 = arith.constant 0 : i32
    return %c0_i32, %c0_i32_0 : i32, i32
  }
  func.func @transform_3(%arg0: i32, %arg1: i32) -> (i32, i32) {
    %c0_i32 = arith.constant 0 : i32
    %c0_i32_0 = arith.constant 0 : i32
    %c0_i32_1 = arith.constant 0 : i32
    return %c0_i32, %c0_i32_0 : i32, i32
  }
  func.func @transform_4(%arg0: i32, %arg1: i32) -> (i32, i32) {
    %c0_i32 = arith.constant 0 : i32
    %c0_i32_0 = arith.constant 0 : i32
    %c0_i32_1 = arith.constant 0 : i32
    return %c0_i32, %c0_i32_0 : i32, i32
  }
  func.func @transform_5(%arg0: i32, %arg1: i32) -> (i32, i32) {
    %c0_i32 = arith.constant 0 : i32
    %c0_i32_0 = arith.constant 0 : i32
    %c0_i32_1 = arith.constant 0 : i32
    return %c0_i32, %c0_i32_0 : i32, i32
  }
  func.func @transform_6(%arg0: i32, %arg1: i32) -> (i32, i32) {
    %c0_i32 = arith.constant 0 : i32
    %c0_i32_0 = arith.constant 0 : i32
    %c0_i32_1 = arith.constant 0 : i32
    return %c0_i32, %c0_i32_0 : i32, i32
  }
  func.func @transform_7(%arg0: i32, %arg1: i32) -> (i32, i32) {
    %c0_i32 = arith.constant 0 : i32
    %c0_i32_0 = arith.constant 0 : i32
    %c0_i32_1 = arith.constant 0 : i32
    return %c0_i32, %c0_i32_0 : i32, i32
  }
  func.func @transform_8(%arg0: i32, %arg1: i32) -> (i32, i32) {
    %c0_i32 = arith.constant 0 : i32
    %c0_i32_0 = arith.constant 0 : i32
    %c0_i32_1 = arith.constant 0 : i32
    return %c0_i32, %c0_i32_0 : i32, i32
  }
  func.func @transform_9(%arg0: i32, %arg1: i32) -> (i32, i32) {
    %c0_i32 = arith.constant 0 : i32
    %c0_i32_0 = arith.constant 0 : i32
    %c0_i32_1 = arith.constant 0 : i32
    return %c0_i32, %c0_i32_0 : i32, i32
  }
  func.func @transform_10(%arg0: i32, %arg1: i32) -> (i32, i32) {
    %c0_i32 = arith.constant 0 : i32
    %c0_i32_0 = arith.constant 0 : i32
    %c0_i32_1 = arith.constant 0 : i32
    return %c0_i32, %c0_i32_0 : i32, i32
  }
  func.func @transform_11(%arg0: i32, %arg1: i32) -> (i32, i32) {
    %c0_i32 = arith.constant 0 : i32
    %c0_i32_0 = arith.constant 0 : i32
    %c0_i32_1 = arith.constant 0 : i32
    return %c0_i32, %c0_i32_0 : i32, i32
  }
  func.func @transform_12(%arg0: i32, %arg1: i32) -> (i32, i32) {
    %c0_i32 = arith.constant 0 : i32
    %c0_i32_0 = arith.constant 0 : i32
    %c0_i32_1 = arith.constant 0 : i32
    return %c0_i32, %c0_i32_0 : i32, i32
  }
  func.func @transform_13(%arg0: i32, %arg1: i32) -> (i32, i32) {
    %c0_i32 = arith.constant 0 : i32
    %c0_i32_0 = arith.constant 0 : i32
    %c0_i32_1 = arith.constant 0 : i32
    return %c0_i32, %c0_i32_0 : i32, i32
  }
  func.func @transform_14(%arg0: i32, %arg1: i32) -> (i32, i32, i32) {
    %c0_i32 = arith.constant 0 : i32
    %c0_i32_0 = arith.constant 0 : i32
    return %arg0, %arg1, %c0_i32 : i32, i32, i32
  }
}

</mosaic_0001>

<bundles_post_ra>
// kernel: tpu_custom_call.1
= control target key start
LH: loop header
LB: loop body
LE: loop exit
PB: predicated region body
PF: predicated region fallthrough
CT: control target
= control target key end

     0   :  { %s5675_s0 = inlined_call_operand.hbm [shape: f32[2,16,128], index: 0, kind: input, shape index: {}]   ;;  %s5676_s1 = inlined_call_operand.vmem [shape: f32[1,128], index: 1, kind: input, shape index: {}]   ;;  %s5677_s2 = inlined_call_operand.vmem [shape: f32[1,128], index: 2, kind: input, shape index: {}]   ;;  %s5678_s3 = inlined_call_operand.hbm [shape: bf16[128,128], index: 3, kind: input, shape index: {}]   ;;  %s5679_s4 = inlined_call_operand.hbm [shape: bf16[128,128], index: 4, kind: input, shape index: {}]   ;;  %s5680_s5 = inlined_call_operand.hbm [shape: bf16[128,128], index: 5, kind: input, shape index: {}]   ;;  %s5681_s6 = inlined_call_operand.hbm [shape: bf16[128,128], index: 6, kind: input, shape index: {}]   ;;  %s5682_s7 = inlined_call_operand.vmem [shape: f32[1,128], index: 7, kind: input, shape index: {}]   ;;  %s5683_s8 = inlined_call_operand.vmem [shape: f32[1,128], index: 8, kind: input, shape index: {}]   ;;  %s5684_s9 = inlined_call_operand.vmem [shape: f32[1,128], index: 9, kind: input, shape index: {}]   ;;  %s5685_s10 = inlined_call_operand.hbm [shape: bf16[128,512], index: 10, kind: input, shape index: {}]   ;;  %s5686_s11 = inlined_call_operand.vmem [shape: f32[1,512], index: 11, kind: input, shape index: {}]   ;;  %s5687_s12 = inlined_call_operand.hbm [shape: bf16[512,128], index: 12, kind: input, shape index: {}]   ;;  %s5688_s13 = inlined_call_operand.vmem [shape: f32[1,128], index: 13, kind: input, shape index: {}]   ;;  %s5689_s14 = inlined_call_operand.hbm [shape: f32[2,16,128], index: 14, kind: output, shape index: {}]  }
   0x1   :  { %5697 = sst [smem:[#allocation24_spill]] %s5678_s3 }
   0x2   :  { %5698 = sst [smem:[#allocation25_spill]] %s5679_s4 }
   0x3   :  { %5699 = sst [smem:[#allocation26_spill]] %s5680_s5 }
   0x4   :  { %5700 = sst [smem:[#allocation27_spill]] %s5681_s6 }
   0x5   :  { %5701 = sst [smem:[#allocation28_spill]] %s5685_s10 }
   0x6   :  { %5702 = sst [smem:[#allocation29_spill]] %s5686_s11 }
   0x7   :  { %5703 = sst [smem:[#allocation30_spill]] %s5687_s12 }
   0x8   :  { %5704 = sst [smem:[#allocation31_spill]] %s5688_s13 }
   0x9   :  { %5705 = sst [smem:[#allocation32_spill]] %s5689_s14 }
   0xa   :  { %19 = vsyncpa [#allocation5], 0 }
   0xb   :  { %21 = vsyncpa [#allocation5 + $0x1], 0 }
   0xc   :  { %22 = vsyncpa [#allocation8], 0 }
   0xd   :  { %23 = vsyncpa [#allocation11], 0 }
   0xe   :  { %24 = vsyncpa [#allocation14], 0 }
   0xf   :  { %25 = vsyncpa [#allocation6], 0 }
  0x10   :  { %27 = vsyncpa [#allocation6 + $0x1], 0  ;;  %s4979_s29 = smov 0   ;;  %s4981_s30 = smov 0  }
  0x11   :  { %s4983_s15 = smov 0   ;;  %s4985_s16 = smov 0  }
  0x12   :  { %s4987_s17 = smov 0   ;;  %s4989_s18 = smov 0  }
  0x13 LB: > { %5706 = sst [smem:[#allocation22_spill]] %s4870_s16  ;;  %s5690_s19 = sadd.s32 4294967295, %s4878_s18   ;;  %s4878_s18 = sphi %s4989_s18, %s33_s18   ;;  %s4874_s17 = sphi %s4987_s17, %s5737_s17   ;;  %s4870_s16 = sphi %s4985_s16, %s5736_s16   ;;  %s4866_s15 = sphi %s4983_s15, %s5735_s15   ;;  %s4862_s30 = sphi %s4981_s30, %s5734_s30   ;;  %s4858_s29 = sphi %s4979_s29, %s5733_s29  }
  0x14   : > { %p3847_p0 = scmp.ge.s32.totalorder %s4878_s18, 1  ;;  %p5013_p1 = scmp.eq.s32.totalorder %s5690_s19, 0 }
  0x15   : > { %p377_p2 = scmp.lt.s32.totalorder %s4878_s18, 3  ;;  %s4880_s22 = smov [#allocation7]  }
  0x16   : > { %s395_s23 = sshll.u32 %s4880_s22, 4  ;;  %s4881_s25 = smov [#allocation10]   ;;  %s396_s23 = int_to_ptr.vmem [resolvable:$true] %s395_s23 }
  0x17   : > { %p5018_p3 = pnand %p3847_p0, %p377_p2  ;;  %s421_s26 = sshll.u32 %s4881_s25, 4  ;;  %s422_s26 = int_to_ptr.vmem [resolvable:$true] %s421_s26 }
  0x18   : > { %s4882_s27 = smov [#allocation13]   ;;  %s4613_s22 = scalar_lea.vmem %s396_s23, 1024 }
  0x19   : > { %p4294_p4 = pneg %p5018_p3  ;;  %s456_s28 = sshll.u32 %s4882_s27, 4  ;;  %s457_s28 = int_to_ptr.vmem [resolvable:$true] %s456_s28 }
  0x1a   : > { %p4614_p8 = scmp.ne.s32.totalorder %s396_s23, %s4613_s22  ;;  %p4621_p11 = scmp.lt.s32.totalorder %s396_s23, %s396_s23 }
  0x1b   : > { %p5027_p6 = pnand %p4294_p4, %p5013_p1  ;;  %p4622_p12 = scmp.lt.s32.totalorder %s4613_s22, %s4613_s22 }
  0x1d   : > { %p5033_p7 = pneg %p5027_p6  ;;  %p4623_p13 = por %p4622_p12, %p4621_p11 }
  0x1f   : > { %p4616_p9 = pnand %p4614_p8, %p5033_p7 }
  0x21   : > { %p4617_p10 = pneg %p4616_p9 }
  0x23   : > { %p4624_p0 = pnand %p4623_p13, %p4617_p10 }
  0x25   : > { %4627 = shalt.err (!%p4624_p0)
}
  0x26   : > { %s5692_s25 = smov 64   ;;  %s5694_s27 = smov 4  }
  0x27   : > { %s5711_s3 = sld [smem:[#allocation24_spill]]  ;;  %s4639_s13 = scalar_lea.vmem %s422_s26, 1024 }
  0x28   : > { %p4640_p2 = scmp.ne.s32.totalorder %s422_s26, %s4639_s13  ;;  %p4647_p9 = scmp.lt.s32.totalorder %s422_s26, %s422_s26 }
  0x29   : > { %p4648_p10 = scmp.lt.s32.totalorder %s4639_s13, %s4639_s13 }
  0x2a   : > { %p4642_p4 = pnand %p4640_p2, %p5033_p7 }
  0x2b   : > { %p4649_p11 = por %p4648_p10, %p4647_p9 }
  0x2c   : > { %p4643_p8 = pneg %p4642_p4 }
  0x2d   : > { %4297 = dma.hbm_to_vmem [thread:$0]  (!%p5027_p6), %s5711_s3, 1024, %s396_s23, [#allocation8], %s5692_s25, %s5692_s25, %s5694_s27  }
  0x2e   : > { %p4650_p12 = pnand %p4649_p11, %p4643_p8 }
  0x30   : > { %4653 = shalt.err (!%p4650_p12)
}
  0x31   : > { %s5712_s5 = sld [smem:[#allocation26_spill]]  ;;  %s4665_s14 = scalar_lea.vmem %s457_s28, 4096 }
  0x32   : > { %p4666_p13 = scmp.ne.s32.totalorder %s457_s28, %s4665_s14  ;;  %p4673_p4 = scmp.lt.s32.totalorder %s457_s28, %s457_s28 }
  0x33   : > { %p4674_p9 = scmp.lt.s32.totalorder %s4665_s14, %s4665_s14 }
  0x34   : > { %p4668_p0 = pnand %p4666_p13, %p5033_p7 }
  0x35   : > { %p4675_p8 = por %p4674_p9, %p4673_p4 }
  0x36   : > { %p4669_p2 = pneg %p4668_p0 }
  0x37   : > { %4303 = dma.hbm_to_vmem [thread:$0]  (!%p5027_p6), %s5712_s5, 1024, %s422_s26, [#allocation11], %s5692_s25, %s5692_s25, %s5694_s27  }
  0x38   : > { %p4676_p10 = pnand %p4675_p8, %p4669_p2 }
  0x3a   : > { %4679 = shalt.err (!%p4676_p10)
}
  0x3b   : > { %s4885_s13 = smov 256   ;;  %s4886_s16 = smov 16  }
  0x3c   : > { %s5713_s10 = sld [smem:[#allocation28_spill]]  ;;  %s4887_s26 = smov [#allocation9]  }
  0x3d   : > { %s408_s22 = sshll.u32 %s4887_s26, 4  ;;  %s4888_s25 = smov [#allocation12]   ;;  %s409_s22 = int_to_ptr.vmem [resolvable:$true] %s408_s22 }
  0x3e   : > { %s434_s27 = sshll.u32 %s4888_s25, 4  ;;  %s4691_s3 = scalar_lea.vmem %s409_s22, 1024  ;;  %s435_s27 = int_to_ptr.vmem [resolvable:$true] %s434_s27 }
  0x3f   : > { %p4692_p11 = scmp.ne.s32.totalorder %s409_s22, %s4691_s3  ;;  %p4699_p0 = scmp.lt.s32.totalorder %s409_s22, %s409_s22 }
  0x40   : > { %p4700_p2 = scmp.lt.s32.totalorder %s4691_s3, %s4691_s3 }
  0x41   : > { %p4694_p12 = pnand %p4692_p11, %p5033_p7 }
  0x42   : > { %4309 = dma.hbm_to_vmem [thread:$0]  (!%p5027_p6), %s5713_s10, 4096, %s457_s28, [#allocation14], %s4885_s13, %s4885_s13, %s4886_s16  }
  0x43   : > { %p4695_p13 = pneg %p4694_p12  ;;  %p4701_p4 = por %p4700_p2, %p4699_p0 }
  0x45   : > { %p4702_p9 = pnand %p4701_p4, %p4695_p13 }
  0x47   : > { %4705 = shalt.err (!%p4702_p9)
}
  0x48   : > { %s5714_s14 = smov 4   ;;  %s5715_s23 = smov 64  }
  0x49   : > { %s5716_s4 = sld [smem:[#allocation25_spill]]  ;;  %s4717_s25 = scalar_lea.vmem %s435_s27, 1024 }
  0x4a   : > { %p4718_p8 = scmp.ne.s32.totalorder %s435_s27, %s4717_s25  ;;  %p4725_p12 = scmp.lt.s32.totalorder %s435_s27, %s435_s27 }
  0x4b   : > { %p4726_p0 = scmp.lt.s32.totalorder %s4717_s25, %s4717_s25 }
  0x4c   : > { %p4720_p10 = pnand %p4718_p8, %p5033_p7 }
  0x4d   : > { %p4727_p13 = por %p4726_p0, %p4725_p12 }
  0x4e   : > { %p4721_p11 = pneg %p4720_p10 }
  0x4f   : > { %4300 = dma.hbm_to_vmem [thread:$0]  (!%p5027_p6), %s5716_s4, 1024, %s409_s22, [#allocation8], %s5715_s23, %s5715_s23, %s5714_s14  }
  0x50   : > { %p4728_p2 = pnand %p4727_p13, %p4721_p11 }
  0x52   : > { %4731 = shalt.err (!%p4728_p2)
}
  0x53   : > { %s5717_s6 = sld [smem:[#allocation27_spill]]  ;;  %s4889_s11 = smov [#allocation15]  }
  0x54   : > { %s472_s26 = sshll.u32 %s4889_s11, 4  ;;  %s473_s26 = int_to_ptr.vmem [resolvable:$true] %s472_s26 }
  0x55   : > { %s4743_s22 = scalar_lea.vmem %s473_s26, 4096  ;;  %p4751_p10 = scmp.lt.s32.totalorder %s473_s26, %s473_s26 }
  0x56   : > { %p4744_p4 = scmp.ne.s32.totalorder %s473_s26, %s4743_s22  ;;  %p4752_p11 = scmp.lt.s32.totalorder %s4743_s22, %s4743_s22 }
  0x58   : > { %p4746_p9 = pnand %p4744_p4, %p5033_p7  ;;  %p4753_p12 = por %p4752_p11, %p4751_p10 }
  0x59   : > { %4306 = dma.hbm_to_vmem [thread:$0]  (!%p5027_p6), %s5717_s6, 1024, %s435_s27, [#allocation11], %s5715_s23, %s5715_s23, %s5714_s14  }
  0x5a   : > { %p4747_p8 = pneg %p4746_p9 }
  0x5c   : > { %p4754_p0 = pnand %p4753_p12, %p4747_p8 }
  0x5e   : > { %4757 = shalt.err (!%p4754_p0)
}
  0x5f   : > { %s5718_s12 = sld [smem:[#allocation30_spill]]  ;;  %s3846_s19 = sadd.s32 4294967294, %s4878_s18  }
  0x60   : > { %s45_s24 = sadd.s32 1, %s4874_s17  ;;  %s52_s13 = sadd.s32 1, %s4866_s15 }
  0x61   : > { %p47_p7 = scmp.ge.s32.totalorder %s45_s24, 2  ;;  %p59_p13 = scmp.ne.s32.totalorder %s4866_s15, %s4862_s30 }
  0x62   : > { %p60_p2 = scmp.eq.s32.totalorder %s4878_s18, 0  ;;  %p65_p9 = scmp.ne.s32.totalorder %s4862_s30, %s4858_s29 }
  0x63   : > { %s5739_s24 = smov (%p47_p7, %s45_s24), 0  ;;  %p370_p12 = scmp.eq.s32.totalorder %s3846_s19, 1 }
  0x64   : > { %5719 = sst [smem:[#allocation23_spill]] %s5739_s24  ;;  %p5102_p4 = por %p60_p2, %p59_p13 }
  0x65   : > { %4312 = dma.hbm_to_vmem [thread:$0]  (!%p5027_p6), %s5718_s12, 4096, %s473_s26, [#allocation14], %s5715_s23, %s5715_s23, %s5714_s14  }
  0x66   : > { %s49_s14 = ssub.s32 %s4874_s17, %s5739_s24  ;;  %s5721_s23 = sadd.s32 4294967295, %s4878_s18  }
  0x67   : > { %p364_p6 = scmp.eq.s32.totalorder %s5721_s23, 1  ;;  %p50_p8 = scmp.eq.s32.totalorder %s49_s14, 0 }
  0x68   : > { %p5114_p10 = por %p5013_p1, %p65_p9  ;;  %p5125_p0 = por %p370_p12, %p65_p9 }
  0x69   : > { %p5118_p11 = por %p364_p6, %p59_p13  ;;  %p4327_p7 = scmp.lt.s32.totalorder %s4878_s18, 2 }
  0x6a   : > { %s5123_s11 = scalar_select %p50_p8, %s4866_s15, %s52_s13  }
  0x6b   : > { %s5724_s26 = scalar_select %p5125_p0, 1, 0 }
  0x6c   : > { %s489_s22 = sand.u32 1, %s4866_s15   ;;  %s4024_s28 = sshll.u32 %s4874_s17, 8 }
  0x6d   : > { %s3855_s27 = sshll.u32 %s489_s22, 4  ;;  %s499_s4 = scalar_lea.hbm %s5675_s0, %s4024_s28 }
  0x6e   : > { %s493_s5 = scalar_lea.vmem [#allocation4], %s3855_s27  ;;  %p5137_p13 = pnand %p4327_p7, %p5102_p4 }
  0x6f   : > { %s500_s6 = sshll.u32 %s493_s5, 4  ;;  %s490_s19 = scalar_lea.sflag [#allocation5], %s489_s22  ;;  %s501_s6 = int_to_ptr.vmem [resolvable:$true] %s500_s6 }
  0x70   : > { %p4760_p2 = pneg %p5137_p13  ;;  %s4771_s13 = scalar_lea.vmem %s501_s6, 256 }
  0x71   : > { %p4772_p9 = scmp.ne.s32.totalorder %s501_s6, %s4771_s13  ;;  %s4890_s12 = smov [#allocation4]  }
  0x72   : > { %s4776_s24 = sshll.u32 %s4890_s12, 4  ;;  %s4777_s24 = int_to_ptr.vmem [resolvable:$false] %s4776_s24 }
  0x73   : > { %p4774_p6 = pnand %p4772_p9, %p4760_p2  ;;  %s4778_s28 = scalar_lea.vmem %s4777_s24, 512 }
  0x74   : > { %p4779_p12 = scmp.lt.s32.totalorder %s501_s6, %s4777_s24  ;;  %p4780_p5 = scmp.lt.s32.totalorder %s4778_s28, %s4771_s13 }
  0x75   : > { %p4775_p8 = pneg %p4774_p6 }
  0x76   : > { %p4781_p0 = por %p4780_p5, %p4779_p12 }
  0x78   : > { %p4782_p4 = pnand %p4781_p0, %p4775_p8 }
  0x7a   : > { %4785 = shalt.err (!%p4782_p4)
}
  0x7b   : > { %s4891_s5 = smov 128   ;;  %s4892_s25 = smov 8  }
  0x7c   : > { %4316 = dma.hbm_to_vmem [thread:$0]  (!%p5137_p13), %s499_s4, 256, %s501_s6, %s490_s19, %s4891_s5, %s4891_s5, %s4892_s25  }
  0x7d   : > { %512 = sbr.rel (%p5018_p3) target bundleno = 2667 (0xa6b), region = 76  ;;  %s5148_s22 = sand.u32 (!%p5018_p3), 1, %s4862_s30  }
  0x7e   : > { %s3859_s12 = sshll.u32 (!%p5018_p3), %s5148_s22, 4  ;;  %s515_s24 = scalar_lea.sflag (!%p5018_p3), [#allocation5], %s5148_s22 }
  0x7f   : > { %s5154_s27 = scalar_lea.vmem (!%p5018_p3), [#allocation4], %s3859_s12 }
  0x82   : > { %4837 = dma.done.wait (%p5114_p10), %s515_s24, 256  }
  0x83   : > { %4839 = vsyncadd (%p5114_p10), %s515_s24, 4294967040 }
  0x84   : > { %4841 = dma.done.wait (%p5013_p1), [#allocation8], 2048  }
  0x85   : > { %4843 = vsyncadd (%p5013_p1), [#allocation8], 4294965248 }
  0x86   : > { %4845 = dma.done.wait (%p5013_p1), [#allocation11], 2048  }
  0x87   : > { %4847 = vsyncadd (%p5013_p1), [#allocation11], 4294965248 }
  0x88   : > { %4849 = dma.done.wait (%p5013_p1), [#allocation14], 8192  }
  0x89   : > { %4851 = vsyncadd (%p5013_p1), [#allocation14], 4294959104  ;;  %v594_v0 = vld [vmem:[%s5154_s27] sm:$0xff]  ;;  %v595_v1 = vld [vmem:[%s5154_s27 + $0x8] sm:$0xff]  ;;  %v4893_v4 = vmov 0.0   ;;  %vm4894_vm0 = vmmov 0  }
  0x8a   : > { %598 = vadd.xlane.f32.xlu0 %v594_v0  ;;  %1518 = vadd.xlane.f32.xlu1 %v594_v0  ;;  %v4420_v2 = vld [vmem:[#allocation9 + $0x38] sm:$0xff]   ;;  %v4422_v21 = vld [vmem:[#allocation9 + $0x30] sm:$0xff]   ;;  %v4424_v23 = vld [vmem:[#allocation9 + $0x28] sm:$0xff]   ;;  %s4895_s21 = smov 64   ;;  %s4896_s3 = smov 96   ;;  %vm1172_vm1 = vcmask 257024  }
  0x8b   : > { %v4421_v3 = vld [vmem:[#allocation10 + $0x38] sm:$0xff]   ;;  %4138 = vmatprep.subr.bf16.mxu0 %v4893_v4  ;;  %4158 = vmatprep.subr.bf16.mxu1 %v4893_v4  ;;  %v4423_v22 = vld [vmem:[#allocation10 + $0x30] sm:$0xff]   ;;  %v4425_v24 = vld [vmem:[#allocation10 + $0x28] sm:$0xff]   ;;  %s4897_s14 = smov 32   ;;  %vm1982_vm2 = vcmask 261120   ;;  %vm2208_vm4 = vcmask 130048  }
  0x8c   : > { %4139 = vmatpush3.bf16.msra.mxu0 %v4420_v2  ;;  %4159 = vmatpush3.bf16.msra.mxu1 %v4421_v3  ;;  %v4426_v25 = vld [vmem:[#allocation9 + $0x20] sm:$0xff]   ;;  %v4428_v27 = vld [vmem:[#allocation9 + $0x18] sm:$0xff]   ;;  %v4430_v29 = vld [vmem:[#allocation9 + $0x10] sm:$0xff]   ;;  %vm2799_vm6 = vcmask 523264   ;;  %vm2802_vm7 = vcmask 785408   ;;  %s5726_s4 = sld [smem:[#allocation29_spill]] }
  0x8d   : > { %4140 = vmatprep.subr.bf16.mxu0 %v4893_v4  ;;  %4160 = vmatprep.subr.bf16.mxu1 %v4893_v4  ;;  %v4427_v26 = vld [vmem:[#allocation10 + $0x20] sm:$0xff]   ;;  %v4429_v28 = vld [vmem:[#allocation10 + $0x18] sm:$0xff]   ;;  %v4431_v30 = vld [vmem:[#allocation10 + $0x10] sm:$0xff]   ;;  %s5727_s20 = sld [smem:[#allocation31_spill]]  ;;  %s4901_s24 = smov [#allocation16]  }
  0x8e   : > { %600 = vadd.xlane.f32.xlu0 %v595_v1  ;;  %1520 = vadd.xlane.f32.xlu1 %v595_v1  ;;  %v4432_v31 = vld [vmem:[#allocation9 + $0x8] sm:$0xff]   ;;  %v4434_v33 = vld [vmem:[#allocation9] sm:$0xff]   ;;  %v4436_v55 = vld [vmem:[#allocation7 + $0x38] sm:$0xff]   ;;  %s5729_s28 = sld [smem:[#allocation32_spill]] }
  0x8f   : > { %4154 = vmatprep.mubr.msk.bf16.mxu0 %vm4894_vm0, %v4893_v4  ;;  %4174 = vmatprep.mubr.msk.bf16.mxu1 %vm4894_vm0, %v4893_v4  ;;  %v4433_v32 = vld [vmem:[#allocation10 + $0x8] sm:$0xff]   ;;  %v4435_v34 = vld [vmem:[#allocation10] sm:$0xff]   ;;  %v4437_v59 = vld [vmem:[#allocation7 + $0x30] sm:$0xff]  }
  0x90   : > { %4141 = vmatpush3.bf16.msra.mxu0 %v4422_v21  ;;  %4161 = vmatpush3.bf16.msra.mxu1 %v4423_v22  ;;  %v3867_v43 = vld [vmem:[%s5676_s1] ss:$0 sm:$0xff]  ;;  %v4438_v60 = vld [vmem:[#allocation7 + $0x28] sm:$0xff]   ;;  %v4440_v62 = vld [vmem:[#allocation7 + $0x18] sm:$0xff]  }
  0x91   : > { %4142 = vmatprep.subr.bf16.mxu0 %v4893_v4  ;;  %4162 = vmatprep.subr.bf16.mxu1 %v4893_v4  ;;  %v3868_v49 = vld [vmem:[%s5677_s2] ss:$0 sm:$0xff] }
  0x92   : > { %v4439_v61 = vld [vmem:[#allocation7 + $0x20] sm:$0xff]  }
  0x94   : > { %4143 = vmatpush3.bf16.msra.mxu0 %v4424_v23  ;;  %4163 = vmatpush3.bf16.msra.mxu1 %v4425_v24 }
  0x95   : > { %4144 = vmatprep.subr.bf16.mxu0 %v4893_v4  ;;  %4164 = vmatprep.subr.bf16.mxu1 %v4893_v4 }
  0x98   : > { %4145 = vmatpush3.bf16.msra.mxu0 %v4426_v25  ;;  %4165 = vmatpush3.bf16.msra.mxu1 %v4427_v26  ;;  %v4898_v26 = vmov 1983009808  }
  0x99   : > { %4146 = vmatprep.subr.bf16.mxu0 %v4893_v4  ;;  %4166 = vmatprep.subr.bf16.mxu1 %v4893_v4 }
  0x9c   : > { %4147 = vmatpush3.bf16.msra.mxu0 %v4428_v27  ;;  %4167 = vmatpush3.bf16.msra.mxu1 %v4429_v28  ;;  %v871_v27 = vunpack.c.l.s4 %v4898_v26  ;;  %v873_v28 = vlaneseq }
  0x9d   : > { %4148 = vmatprep.subr.bf16.mxu0 %v4893_v4  ;;  %4168 = vmatprep.subr.bf16.mxu1 %v4893_v4 }
  0xa0   : > { %4149 = vmatpush3.bf16.msra.mxu0 %v4430_v29  ;;  %4169 = vmatpush3.bf16.msra.mxu1 %v4431_v30  ;;  %v4899_v29 = vmov 1934713408  }
  0xa1   : > { %4150 = vmatprep.subr.bf16.mxu0 %v4893_v4  ;;  %4170 = vmatprep.subr.bf16.mxu1 %v4893_v4  ;;  %v903_v30 = vunpack.c.l.s4 %v4899_v29 }
  0xa4   : > { %4151 = vmatpush3.bf16.msra.mxu0 %v4432_v31  ;;  %4171 = vmatpush3.bf16.msra.mxu1 %v4433_v32  ;;  %v872_v31 = vunpack.c.0.s8 %v871_v27  ;;  %v5268_v32 = vshrl.u32 %v873_v28, 7 }
  0xa5   : > { %4152 = vmatprep.subr.bf16.mxu0 %v4893_v4  ;;  %4172 = vmatprep.subr.bf16.mxu1 %v4893_v4 }
  0xa8   : > { %4153 = vmatpush3.bf16.msra.mxu0 %v4434_v33  ;;  %4173 = vmatpush3.bf16.msra.mxu1 %v4435_v34 }
  0xa9   : > { %4178 = vmatprep.subr.bf16.mxu0 %v4893_v4  ;;  %4198 = vmatprep.subr.bf16.mxu1 %v4893_v4 }
 0x113   : > { %v599_v5 = vpop.xlane.xlu0 %598  ;;  %v1519_v6 = vpop.xlane.xlu1 %1518 }
 0x114   : > { %v603_v7 = vmul.f32 0.0078125, %v599_v5  ;;  %v1523_v8 = vmul.f32 0.0078125, %v1519_v6  ;;  %v4442_v5 = vld [vmem:[#allocation7 + $0x8] sm:$0xff]  }
 0x116   : > { %v5178_v9 = vsub.f32 %v594_v0, %v603_v7  ;;  %v5180_v10 = vsub.f32 %v594_v0, %v1523_v8  ;;  %v4443_v8 = vld [vmem:[#allocation7] sm:$0xff]  }
 0x117   : > { %v601_v11 = vpop.xlane.xlu0 %600  ;;  %v1521_v12 = vpop.xlane.xlu1 %1520 }
 0x118   : > { %v604_v13 = vmul.f32 0.0078125, %v601_v11  ;;  %v607_v14 = vmul.f32 %v5178_v9, %v5178_v9  ;;  %v1524_v15 = vmul.f32 0.0078125, %v1521_v12  ;;  %v1527_v18 = vmul.f32 %v5180_v10, %v5180_v10 }
 0x11a   : > { %v5184_v16 = vsub.f32 %v595_v1, %v604_v13  ;;  %609 = vadd.xlane.f32.xlu0 %v607_v14  ;;  %v5186_v17 = vsub.f32 %v595_v1, %v1524_v15  ;;  %v4441_v1 = vld [vmem:[#allocation7 + $0x10] sm:$0xff]  }
 0x11c   : > { %v608_v19 = vmul.f32 %v5184_v16, %v5184_v16  ;;  %v1528_v20 = vmul.f32 %v5186_v17, %v5186_v17 }
 0x11e   : > { %1529 = vadd.xlane.f32.xlu0 %v1527_v18  ;;  %611 = vadd.xlane.f32.xlu1 %v608_v19 }
 0x122   : > { %1531 = vadd.xlane.f32.xlu1 %v1528_v20 }
 0x1a3   : > { %v610_v35 = vpop.xlane.xlu0 %609 }
 0x1a4   : > { %v613_v36 = vmul.f32 0.0078125, %v610_v35  ;;  %v904_v35 = vunpack.c.0.s8 %v903_v30 }
 0x1a6   : > { %v615_v37 = vadd.f32 1e-05, %v613_v36  ;;  %v5271_v36 = vsub.s32 %v872_v31, %v5268_v32 }
 0x1a7   : > { %v612_v38 = vpop.xlane.xlu1 %611  ;;  %v1530_v48 = vpop.xlane.xlu0 %1529 }
 0x1a8   : > { %4540 = vrsqrt.f32 %v615_v37  ;;  %v614_v39 = vmul.f32 0.0078125, %v612_v38  ;;  %v1533_v52 = vmul.f32 0.0078125, %v1530_v48 }
 0x1aa   : > { %v616_v40 = vadd.f32 1e-05, %v614_v39  ;;  %v1535_v58 = vadd.f32 1e-05, %v1533_v52 }
 0x1ab   : > { %v1532_v45 = vpop.xlane.xlu1 %1531 }
 0x1ac   : > { %4542 = vrsqrt.f32 %v616_v40  ;;  %v1534_v50 = vmul.f32 0.0078125, %v1532_v45 }
 0x1ae   : > { %v1536_v56 = vadd.f32 1e-05, %v1534_v50 }
 0x1b0   : > { %4544 = vrsqrt.f32 %v1536_v56 }
 0x1b1   : > { %4546 = vrsqrt.f32 %v1535_v58 }
 0x1b5   : > { %v4541_v41 = vpop.eup %4540 }
 0x1b6   : > { %v619_v42 = vmul.f32 %v4541_v41, %v5178_v9 }
 0x1b8   : > { %v627_v47 = vmul.f32 %v3867_v43, %v619_v42 }
 0x1b9   : > { %v4543_v44 = vpop.eup %4542 }
 0x1ba   : > { %v620_v46 = vmul.f32 %v4543_v44, %v5184_v16  ;;  %v635_v53 = vadd.f32 %v3868_v49, %v627_v47 }
 0x1bc   : > { %v628_v51 = vmul.f32 %v3867_v43, %v620_v46 }
 0x1bd   : > { %v4545_v63 = vpop.eup %4544 }
 0x1be   : > { %v636_v54 = vadd.f32 %v3868_v49, %v628_v51  ;;  %v4547_v0 = vpop.eup %4546  ;;  %v1540_v2 = vmul.f32 %v4545_v63, %v5186_v17 }
 0x1bf   : > { %v1539_v3 = vmul.f32 %v4547_v0, %v5180_v10 }
 0x1c0   : > { %v637_v57 = vpack.c.bf16 %v636_v54, %v635_v53  ;;  %v1548_v6 = vmul.f32 %v3867_v43, %v1540_v2 }
 0x1c1   : > { %v1547_v7 = vmul.f32 %v3867_v43, %v1539_v3  ;;  %v5274_v43 = vsub.s32 %v904_v35, %v5268_v32 }
 0x1c2   : > { %4155 = vmatmul.mubr.bf16.vlgmr.msra.gmra.mxu0 %v637_v57  ;;  %4175 = vmatmul.mubr.bf16.vlgmr.msra.gmra.mxu1 %v637_v57  ;;  %v1556_v9 = vadd.f32 %v3868_v49, %v1548_v6 }
 0x1c3   : > { %4179 = vmatpush3.bf16.msra.mxu0 %v4436_v55  ;;  %4194 = vmatprep.mubr.msk.bf16.mxu0 %vm4894_vm0, %v4893_v4  ;;  %v1555_v11 = vadd.f32 %v3868_v49, %v1547_v7 }
 0x1c4   : > { %4180 = vmatprep.subr.bf16.mxu0 %v4893_v4  ;;  %4200 = vmatprep.mubr.msk.bf16.mxu1 %vm4894_vm0, %v4893_v4 }
 0x1c5   : > { %v1557_v12 = vpack.c.bf16 %v1556_v9, %v1555_v11 }
 0x1c7   : > { %4181 = vmatpush3.bf16.msra.mxu0 %v4437_v59 }
 0x1c8   : > { %4182 = vmatprep.subr.bf16.mxu0 %v4893_v4 }
 0x1cb   : > { %4183 = vmatpush3.bf16.msra.mxu0 %v4438_v60 }
 0x1cc   : > { %4184 = vmatprep.subr.bf16.mxu0 %v4893_v4 }
 0x1cf   : > { %4185 = vmatpush3.bf16.msra.mxu0 %v4439_v61 }
 0x1d0   : > { %4186 = vmatprep.subr.bf16.mxu0 %v4893_v4 }
 0x1d3   : > { %4187 = vmatpush3.bf16.msra.mxu0 %v4440_v62 }
 0x1d4   : > { %4188 = vmatprep.subr.bf16.mxu0 %v4893_v4 }
 0x1d7   : > { %4189 = vmatpush3.bf16.msra.mxu0 %v4441_v1 }
 0x1d8   : > { %4190 = vmatprep.subr.bf16.mxu0 %v4893_v4 }
 0x1db   : > { %4191 = vmatpush3.bf16.msra.mxu0 %v4442_v5 }
 0x1dc   : > { %4192 = vmatprep.subr.bf16.mxu0 %v4893_v4 }
 0x1df   : > { %4193 = vmatpush3.bf16.msra.mxu0 %v4443_v8 }
 0x1e0   : > { %4246 = vmatprep.subr.bf16.mxu0 %v4893_v4 }
 0x1e2   : > { %4195 = vmatmul.mubr.bf16.vlgmr.msra.gmra.mxu0 %v1557_v12 }
 0x1e3   : > { %4262 = vmatprep.mubr.msk.bf16.mxu0 %vm4894_vm0, %v4893_v4 }
 0x282   : > { %v736_v10 = vpop.f32.mrf.mxu0  ;;  %v5236_v13 = vpop.f32.mrf.mxu1 }
 0x283   : > { %856 = vrot.lane.b32.xlu1 %v736_v10, %s4895_s21  ;;  %850 = vrot.lane.b32.xlu0 %v736_v10, %s4896_s3 }
 0x284   : > { %v4156_v14 = vpop.f32.mrf.mxu0  ;;  %v4176_v15 = vpop.f32.mrf.mxu1 }
 0x286   : > { %v5240_v16 = vpop.f32.mrf.mxu0  ;;  %v5242_v17 = vpop.f32.mrf.mxu1 }
 0x287   : > { %862 = vrot.lane.b32.xlu0 %v736_v10, %s4897_s14  ;;  %852 = vrot.lane.b32.xlu1 %v5240_v16, %s4896_s3 }
 0x288   : > { %v4157_v18 = vpop.f32.mrf.mxu0  ;;  %v4177_v19 = vpop.f32.mrf.mxu1 }
 0x28b   : > { %858 = vrot.lane.b32.xlu1 %v5240_v16, %s4895_s21 }
 0x28f   : > { %864 = vrot.lane.b32.xlu1 %v5240_v16, %s4897_s14 }
 0x2a2   : > { %v1656_v20 = vpop.f32.mrf.mxu0 }
 0x2a3   : > { %v5251_v21 = vmul.f32 0.17677669, %v1656_v20 }
 0x2a4   : > { %v4196_v22 = vpop.f32.mrf.mxu0 }
 0x2a5   : > { %1667 = vrot.lane.b32.xlu0 %v5251_v21, %s4896_s3 }
 0x2a6   : > { %v1659_v23 = vpop.f32.mrf.mxu0 }
 0x2a7   : > { %v5255_v24 = vmul.f32 0.17677669, %v1659_v23 }
 0x2a8   : > { %v4197_v25 = vpop.f32.mrf.mxu0 }
 0x2a9   : > { %1673 = vrot.lane.b32.xlu0 %v5251_v21, %s4895_s21  ;;  %1669 = vrot.lane.b32.xlu1 %v5255_v24, %s4896_s3 }
 0x2ad   : > { %1679 = vrot.lane.b32.xlu0 %v5251_v21, %s4897_s14  ;;  %1675 = vrot.lane.b32.xlu1 %v5255_v24, %s4895_s21 }
 0x2b1   : > { %1681 = vrot.lane.b32.xlu1 %v5255_v24, %s4897_s14 }
 0x2f5   : > { %v857_v33 = vpop.permute.xlu1 %856  ;;  %v851_v34 = vpop.permute.xlu0 %850 }
 0x2f6   : > { %v868_v37 = vcombine.low %v736_v10, %v857_v33  ;;  %v869_v38 = vcombine.high %v736_v10, %v857_v33 }
 0x2f8   : > { %v876_v44 = vrot.slane %v868_v37, %v5271_v36  ;;  %v883_v45 = vrot.slane %v869_v38, %v5271_v36 }
 0x2f9   : > { %v853_v39 = vpop.permute.xlu1 %852  ;;  %v863_v40 = vpop.permute.xlu0 %862 }
 0x2fa   : > { %v884_v41 = vcombine.low %v851_v34, %v863_v40  ;;  %v885_v42 = vcombine.high %v851_v34, %v863_v40 }
 0x2fc   : > { %v892_v46 = vrot.slane %v884_v41, %v5271_v36  ;;  %v899_v47 = vrot.slane %v885_v42, %v5271_v36 }
 0x2fd   : > { %v859_v48 = vpop.permute.xlu1 %858 }
 0x2fe   : > { %v900_v49 = vcombine.low %v876_v44, %v892_v46  ;;  %v901_v50 = vcombine.high %v876_v44, %v892_v46  ;;  %v916_v51 = vcombine.low %v883_v45, %v899_v47  ;;  %v917_v52 = vcombine.high %v883_v45, %v899_v47 }
 0x2ff   : > { %v936_v57 = vcombine.low %v5240_v16, %v859_v48  ;;  %v937_v58 = vcombine.high %v5240_v16, %v859_v48 }
 0x300   : > { %v908_v53 = vrot.slane %v900_v49, %v5274_v43  ;;  %v915_v54 = vrot.slane %v901_v50, %v5274_v43  ;;  %v924_v55 = vrot.slane %v916_v51, %v5274_v43  ;;  %v931_v56 = vrot.slane %v917_v52, %v5274_v43 }
 0x301   : > { %v865_v59 = vpop.permute.xlu1 %864  ;;  %v944_v7 = vrot.slane %v936_v57, %v5271_v36  ;;  %v951_v8 = vrot.slane %v937_v58, %v5271_v36 }
 0x302   : > { %v1004_v60 = vcombine.low %v908_v53, %v915_v54  ;;  %v3885_v61 = vcombine.high %v908_v53, %v915_v54  ;;  %v1020_v62 = vcombine.low %v924_v55, %v931_v56  ;;  %v3886_v63 = vcombine.high %v924_v55, %v931_v56 }
 0x303   : > { %v952_v0 = vcombine.low %v853_v39, %v865_v59  ;;  %v953_v1 = vcombine.high %v853_v39, %v865_v59 }
 0x304   : > { %v1011_v2 = vrot.slane %v1004_v60, %v5271_v36  ;;  %v1019_v3 = vrot.slane %v3885_v61, %v5271_v36  ;;  %v1027_v5 = vrot.slane %v1020_v62, %v5271_v36  ;;  %v1035_v6 = vrot.slane %v3886_v63, %v5271_v36 }
 0x305   : > { %v960_v9 = vrot.slane %v952_v0, %v5271_v36  ;;  %v967_v11 = vrot.slane %v953_v1, %v5271_v36 }
 0x306   : > { %v1036_v12 = vcombine.low %v1011_v2, %v1019_v3  ;;  %v1037_v10 = vcombine.high %v1011_v2, %v1019_v3  ;;  %v1052_v14 = vcombine.low %v1027_v5, %v1035_v6  ;;  %v1053_v15 = vcombine.high %v1027_v5, %v1035_v6 }
 0x307   : > { %v968_v16 = vcombine.low %v944_v7, %v960_v9  ;;  %v969_v18 = vcombine.high %v944_v7, %v960_v9  ;;  %v984_v19 = vcombine.low %v951_v8, %v967_v11  ;;  %v985_v20 = vcombine.high %v951_v8, %v967_v11 }
 0x308   : > { %v1044_v22 = vrot.slane %v1036_v12, %v5274_v43  ;;  %v1051_v23 = vrot.slane %v1037_v10, %v5274_v43  ;;  %v1060_v25 = vrot.slane %v1052_v14, %v5274_v43  ;;  %v1067_v26 = vrot.slane %v1053_v15, %v5274_v43 }
 0x309   : > { %v976_v27 = vrot.slane %v968_v16, %v5274_v43  ;;  %v983_v29 = vrot.slane %v969_v18, %v5274_v43  ;;  %v992_v30 = vrot.slane %v984_v19, %v5274_v43  ;;  %v999_v31 = vrot.slane %v985_v20, %v5274_v43 }
 0x30a   : > { %v1068_v33 = vcombine.low %v1044_v22, %v1060_v25  ;;  %v1069_v34 = vcombine.high %v1044_v22, %v1060_v25  ;;  %v1070_v35 = vcombine.low %v1051_v23, %v1067_v26  ;;  %v1071_v37 = vcombine.high %v1051_v23, %v1067_v26 }
 0x30b   : > { %v1072_v38 = vcombine.low %v976_v27, %v983_v29  ;;  %v3887_v39 = vcombine.high %v976_v27, %v983_v29  ;;  %v1088_v40 = vcombine.low %v992_v30, %v999_v31  ;;  %v3888_v41 = vcombine.high %v992_v30, %v999_v31 }
 0x30c   : > { %v4025_v42 = vpack.c.bf16 %v1068_v33, %v1068_v33  ;;  %v4027_v44 = vpack.c.bf16 %v1069_v34, %v1069_v34  ;;  %v4029_v45 = vpack.c.bf16 %v1070_v35, %v1070_v35  ;;  %v4031_v46 = vpack.c.bf16 %v1071_v37, %v1071_v37 }
 0x30d   : > { %v1079_v47 = vrot.slane %v1072_v38, %v5271_v36  ;;  %v1087_v48 = vrot.slane %v3887_v39, %v5271_v36  ;;  %v1095_v49 = vrot.slane %v1088_v40, %v5271_v36  ;;  %v1103_v50 = vrot.slane %v3888_v41, %v5271_v36 }
 0x30e   : > { %1173 = vst.msk [vmem:[#allocation2] sm:$0xf] %vm1172_vm1, %v4025_v42  ;;  %1175 = vst.msk [vmem:[#allocation2 + $0x8] sm:$0xf] %vm1172_vm1, %v4027_v44 }
 0x30f   : > { %1177 = vst.msk [vmem:[#allocation2 + $0x10] sm:$0xf] %vm1172_vm1, %v4029_v45  ;;  %1179 = vst.msk [vmem:[#allocation2 + $0x18] sm:$0xf] %vm1172_vm1, %v4031_v46  ;;  %v1104_v51 = vcombine.low %v1079_v47, %v1087_v48  ;;  %v1105_v52 = vcombine.high %v1079_v47, %v1087_v48  ;;  %v1120_v53 = vcombine.low %v1095_v49, %v1103_v50 }
 0x310   : > { %v1121_v54 = vcombine.high %v1095_v49, %v1103_v50 }
 0x311   : > { %v1112_v55 = vrot.slane %v1104_v51, %v5274_v43  ;;  %v1119_v56 = vrot.slane %v1105_v52, %v5274_v43  ;;  %v1128_v57 = vrot.slane %v1120_v53, %v5274_v43 }
 0x312   : > { %v1135_v58 = vrot.slane %v1121_v54, %v5274_v43 }
 0x313   : > { %v1136_v59 = vcombine.low %v1112_v55, %v1128_v57  ;;  %v1137_v60 = vcombine.high %v1112_v55, %v1128_v57 }
 0x314   : > { %v1138_v61 = vcombine.low %v1119_v56, %v1135_v58  ;;  %v1139_v62 = vcombine.high %v1119_v56, %v1135_v58 }
 0x315   : > { %v4026_v63 = vpack.c.bf16 %v1136_v59, %v1136_v59  ;;  %v4028_v0 = vpack.c.bf16 %v1137_v60, %v1137_v60 }
 0x316   : > { %v4030_v1 = vpack.c.bf16 %v1138_v61, %v1138_v61  ;;  %v4032_v2 = vpack.c.bf16 %v1139_v62, %v1139_v62 }
 0x317   : > { %1174 = vst.msk [vmem:[#allocation2 + $0x4] sm:$0xf] %vm1172_vm1, %v4026_v63  ;;  %1176 = vst.msk [vmem:[#allocation2 + $0xc] sm:$0xf] %vm1172_vm1, %v4028_v0  ;;  %v1668_v3 = vpop.permute.xlu0 %1667 }
 0x318   : > { %1178 = vst.msk [vmem:[#allocation2 + $0x14] sm:$0xf] %vm1172_vm1, %v4030_v1  ;;  %1180 = vst.msk [vmem:[#allocation2 + $0x1c] sm:$0xf] %vm1172_vm1, %v4032_v2 }
 0x31b   : > { %v1670_v5 = vpop.permute.xlu1 %1669  ;;  %v1674_v6 = vpop.permute.xlu0 %1673 }
 0x31c   : > { %v1685_v7 = vcombine.low %v5251_v21, %v1674_v6  ;;  %v1686_v8 = vcombine.high %v5251_v21, %v1674_v6 }
 0x31e   : > { %v4444_v9 = vld [vmem:[#allocation2] sm:$0xff]   ;;  %v1693_v16 = vrot.slane %v1685_v7, %v5271_v36  ;;  %v1700_v18 = vrot.slane %v1686_v8, %v5271_v36 }
 0x31f   : > { %v1676_v11 = vpop.permute.xlu1 %1675  ;;  %v1680_v12 = vpop.permute.xlu0 %1679  ;;  %v1987_v15 = vsel %vm1982_vm2, %v4444_v9, 0 }
 0x320   : > { %v1701_v10 = vcombine.low %v1668_v3, %v1680_v12  ;;  %v1702_v14 = vcombine.high %v1668_v3, %v1680_v12  ;;  %4199 = vmatpush3.bf16.xpose.msra.mxu1 %v1987_v15  ;;  %v1753_v22 = vcombine.low %v5255_v24, %v1676_v11  ;;  %v1754_v21 = vcombine.high %v5255_v24, %v1676_v11 }
 0x321   : > { %4204 = vmatprep.subr.bf16.mxu1 %v4893_v4 }
 0x322   : > { %v1709_v19 = vrot.slane %v1701_v10, %v5271_v36  ;;  %v1716_v20 = vrot.slane %v1702_v14, %v5271_v36  ;;  %v1761_v38 = vrot.slane %v1753_v22, %v5271_v36  ;;  %v1768_v24 = vrot.slane %v1754_v21, %v5271_v36  ;;  %v4445_v14 = vld [vmem:[#allocation2 + $0x8] sm:$0xff]  }
 0x323   : > { %v1682_v23 = vpop.permute.xlu1 %1681 }
 0x324   : > { %v1717_v25 = vcombine.low %v1693_v16, %v1709_v19  ;;  %v1718_v26 = vcombine.high %v1693_v16, %v1709_v19  ;;  %v1733_v27 = vcombine.low %v1700_v18, %v1716_v20  ;;  %v1734_v29 = vcombine.high %v1700_v18, %v1716_v20 }
 0x325   : > { %v1769_v30 = vcombine.low %v1670_v5, %v1682_v23  ;;  %v1770_v31 = vcombine.high %v1670_v5, %v1682_v23  ;;  %v2039_v16 = vsel %vm1982_vm2, %v4445_v14, 0 }
 0x326   : > { %v1725_v33 = vrot.slane %v1717_v25, %v5274_v43  ;;  %v1732_v34 = vrot.slane %v1718_v26, %v5274_v43  ;;  %v1741_v35 = vrot.slane %v1733_v27, %v5274_v43  ;;  %v1748_v37 = vrot.slane %v1734_v29, %v5274_v43  ;;  %v4446_v25 = vld [vmem:[#allocation2 + $0x10] sm:$0xff]  }
 0x327   : > { %v1777_v39 = vrot.slane %v1769_v30, %v5271_v36  ;;  %v1784_v40 = vrot.slane %v1770_v31, %v5271_v36 }
 0x328   : > { %v1821_v41 = vcombine.low %v1725_v33, %v1732_v34  ;;  %v3919_v42 = vcombine.high %v1725_v33, %v1732_v34  ;;  %v1837_v44 = vcombine.low %v1741_v35, %v1748_v37  ;;  %v3920_v45 = vcombine.high %v1741_v35, %v1748_v37  ;;  %v4447_v37 = vld [vmem:[#allocation2 + $0x18] sm:$0xff]  }
 0x329   : > { %v1785_v46 = vcombine.low %v1761_v38, %v1777_v39  ;;  %v1786_v47 = vcombine.high %v1761_v38, %v1777_v39  ;;  %v1801_v48 = vcombine.low %v1768_v24, %v1784_v40  ;;  %v1802_v49 = vcombine.high %v1768_v24, %v1784_v40 }
 0x32a   : > { %v1828_v50 = vrot.slane %v1821_v41, %v5271_v36  ;;  %v1836_v51 = vrot.slane %v3919_v42, %v5271_v36  ;;  %v1844_v52 = vrot.slane %v1837_v44, %v5271_v36  ;;  %v1852_v53 = vrot.slane %v3920_v45, %v5271_v36 }
 0x32b   : > { %v1793_v54 = vrot.slane %v1785_v46, %v5274_v43  ;;  %v1800_v55 = vrot.slane %v1786_v47, %v5274_v43  ;;  %v1809_v56 = vrot.slane %v1801_v48, %v5274_v43  ;;  %v1816_v57 = vrot.slane %v1802_v49, %v5274_v43 }
 0x32c   : > { %v1853_v58 = vcombine.low %v1828_v50, %v1836_v51  ;;  %v1869_v59 = vcombine.low %v1844_v52, %v1852_v53  ;;  %v1854_v22 = vcombine.high %v1828_v50, %v1836_v51  ;;  %v1870_v21 = vcombine.high %v1844_v52, %v1852_v53 }
 0x32d   : > { %v1889_v60 = vcombine.low %v1793_v54, %v1800_v55  ;;  %v3921_v61 = vcombine.high %v1793_v54, %v1800_v55  ;;  %v1905_v62 = vcombine.low %v1809_v56, %v1816_v57  ;;  %v3922_v63 = vcombine.high %v1809_v56, %v1816_v57 }
 0x32e   : > { %v1861_v5 = vrot.slane %v1853_v58, %v5274_v43  ;;  %v1877_v6 = vrot.slane %v1869_v59, %v5274_v43  ;;  %v1868_v30 = vrot.slane %v1854_v22, %v5274_v43  ;;  %v1884_v31 = vrot.slane %v1870_v21, %v5274_v43 }
 0x32f   : > { %v1896_v0 = vrot.slane %v1889_v60, %v5271_v36  ;;  %v1904_v1 = vrot.slane %v3921_v61, %v5271_v36  ;;  %v1912_v2 = vrot.slane %v1905_v62, %v5271_v36  ;;  %v1920_v3 = vrot.slane %v3922_v63, %v5271_v36 }
 0x330   : > { %v1885_v12 = vcombine.low %v1861_v5, %v1877_v6  ;;  %v1886_v23 = vcombine.high %v1861_v5, %v1877_v6  ;;  %v2091_v33 = vsel %vm1982_vm2, %v4446_v25, 0  ;;  %v1887_v35 = vcombine.low %v1868_v30, %v1884_v31 }
 0x331   : > { %v1921_v7 = vcombine.low %v1896_v0, %v1904_v1  ;;  %v1937_v8 = vcombine.low %v1912_v2, %v1920_v3  ;;  %v1922_v18 = vcombine.high %v1896_v0, %v1904_v1  ;;  %v1938_v19 = vcombine.high %v1912_v2, %v1920_v3 }
 0x332   : > { %v2143_v24 = vsel %vm1982_vm2, %v4447_v37, 0  ;;  %v1888_v40 = vcombine.high %v1868_v30, %v1884_v31  ;;  %v2193_v42 = vand.u32 127, %v873_v28  ;;  %v2188_v44 = vadd.s32 8, %v5268_v32 }
 0x333   : > { %v1929_v9 = vrot.slane %v1921_v7, %v5274_v43  ;;  %v1945_v11 = vrot.slane %v1937_v8, %v5274_v43  ;;  %v1936_v26 = vrot.slane %v1922_v18, %v5274_v43  ;;  %v1952_v27 = vrot.slane %v1938_v19, %v5274_v43 }
 0x334   : > { %vm2194_vm3 = vcmp.le.s32.totalorder %v2193_v42, %v5268_v32  ;;  %vm2195_vm5 = vcmp.le.s32.totalorder %v2193_v42, %v2188_v44 }
 0x335   : > { %v1953_v10 = vcombine.low %v1929_v9, %v1945_v11  ;;  %v1954_v20 = vcombine.high %v1929_v9, %v1945_v11  ;;  %v1955_v34 = vcombine.low %v1936_v26, %v1952_v27  ;;  %v1956_v39 = vcombine.high %v1936_v26, %v1952_v27 }
 0x337   : > { %v1957_v15 = vpack.c.bf16 %v1953_v10, %v1885_v12  ;;  %v1958_v29 = vpack.c.bf16 %v1954_v20, %v1886_v23  ;;  %v1959_v38 = vpack.c.bf16 %v1955_v34, %v1887_v35  ;;  %v1960_v41 = vpack.c.bf16 %v1956_v39, %v1888_v40 }
 0x339   : > { %4201 = vmatmul.mubr.msk.bf16.vlgmr.msra.gmra.mxu1 %vm1982_vm2, %v1957_v15 }
 0x33a   : > { %4205 = vmatpush3.bf16.xpose.msra.mxu1 %v2039_v16  ;;  %4206 = vmatprep.mubr.msk.bf16.mxu1 %vm4894_vm0, %v4893_v4 }
 0x33b   : > { %4210 = vmatprep.subr.bf16.mxu1 %v4893_v4 }
 0x341   : > { %4207 = vmatmul.mubr.msk.bf16.vlgmr.msra.gmra.mxu1 %vm1982_vm2, %v1958_v29 }
 0x342   : > { %4211 = vmatpush3.bf16.xpose.msra.mxu1 %v2091_v33  ;;  %4212 = vmatprep.mubr.msk.bf16.mxu1 %vm4894_vm0, %v4893_v4 }
 0x343   : > { %4216 = vmatprep.subr.bf16.mxu1 %v4893_v4 }
 0x349   : > { %4213 = vmatmul.mubr.msk.bf16.vlgmr.msra.gmra.mxu1 %vm1982_vm2, %v1959_v38 }
 0x34a   : > { %4217 = vmatpush3.bf16.xpose.msra.mxu1 %v2143_v24  ;;  %4218 = vmatprep.mubr.msk.bf16.mxu1 %vm4894_vm0, %v4893_v4 }
 0x34b   : > { %4222 = vmatprep.subr.bf16.mxu1 %v4893_v4 }
 0x351   : > { %4219 = vmatmul.mubr.msk.bf16.vlgmr.msra.gmra.mxu1 %vm1982_vm2, %v1960_v41 }
 0x352   : > { %4224 = vmatprep.mubr.msk.bf16.mxu1 %vm4894_vm0, %v4893_v4 }
 0x3f9   : > { %v2023_v45 = vpop.f32.mrf.mxu1 }
 0x3fa   : > { %v2200_v46 = vsel %vm2194_vm3, %v2023_v45, -1e+30 }
 0x3fb   : > { %v4202_v47 = vpop.f32.mrf.mxu1  ;;  %v2209_v48 = vsel %vm2208_vm4, %v2200_v46, -inf }
 0x3fc   : > { %2210 = vmax.xlane.f32.xlu0 %v2209_v48 }
 0x3fd   : > { %v2026_v49 = vpop.f32.mrf.mxu1 }
 0x3fe   : > { %v2201_v50 = vsel %vm2195_vm5, %v2026_v49, -1e+30 }
 0x3ff   : > { %v4203_v51 = vpop.f32.mrf.mxu1  ;;  %v2212_v28 = vsel %vm2208_vm4, %v2201_v50, -inf }
 0x400   : > { %2213 = vmax.xlane.f32.xlu1 %v2212_v28 }
 0x401   : > { %v2075_v52 = vpop.f32.mrf.mxu1 }
 0x402   : > { %v2202_v53 = vsel %vm2194_vm3, %v2075_v52, -1e+30 }
 0x403   : > { %v4208_v54 = vpop.f32.mrf.mxu1  ;;  %v2215_v55 = vsel %vm2208_vm4, %v2202_v53, -inf }
 0x404   : > { %2216 = vmax.xlane.f32.xlu0 %v2215_v55 }
 0x405   : > { %v2078_v56 = vpop.f32.mrf.mxu1 }
 0x406   : > { %v2203_v57 = vsel %vm2195_vm5, %v2078_v56, -1e+30 }
 0x407   : > { %v4209_v58 = vpop.f32.mrf.mxu1  ;;  %v2218_v59 = vsel %vm2208_vm4, %v2203_v57, -inf }
 0x408   : > { %2219 = vmax.xlane.f32.xlu0 %v2218_v59 }
 0x409   : > { %v2127_v60 = vpop.f32.mrf.mxu1 }
 0x40a   : > { %v2204_v61 = vsel %vm2194_vm3, %v2127_v60, -1e+30 }
 0x40b   : > { %v4214_v62 = vpop.f32.mrf.mxu1  ;;  %v2221_v63 = vsel %vm2208_vm4, %v2204_v61, -inf }
 0x40c   : > { %2222 = vmax.xlane.f32.xlu0 %v2221_v63 }
 0x40d   : > { %v2130_v0 = vpop.f32.mrf.mxu1 }
 0x40e   : > { %v2205_v1 = vsel %vm2195_vm5, %v2130_v0, -1e+30 }
 0x40f   : > { %v4215_v2 = vpop.f32.mrf.mxu1  ;;  %v2224_v3 = vsel %vm2208_vm4, %v2205_v1, -inf }
 0x410   : > { %2225 = vmax.xlane.f32.xlu1 %v2224_v3 }
 0x411   : > { %v2179_v5 = vpop.f32.mrf.mxu1 }
 0x412   : > { %v2206_v6 = vsel %vm2194_vm3, %v2179_v5, -1e+30 }
 0x413   : > { %v4220_v7 = vpop.f32.mrf.mxu1  ;;  %v2227_v8 = vsel %vm2208_vm4, %v2206_v6, -inf }
 0x414   : > { %2228 = vmax.xlane.f32.xlu0 %v2227_v8 }
 0x415   : > { %v2182_v9 = vpop.f32.mrf.mxu1 }
 0x416   : > { %v2207_v11 = vsel %vm2195_vm5, %v2182_v9, -1e+30 }
 0x417   : > { %v4221_v12 = vpop.f32.mrf.mxu1  ;;  %v2230_v10 = vsel %vm2208_vm4, %v2207_v11, -inf }
 0x418   : > { %2231 = vmax.xlane.f32.xlu1 %v2230_v10 }
 0x429   : > { %1185 = vrot.lane.b32.xlu1 %v5242_v17, %s4896_s3 }
 0x42a   : > { %1183 = vrot.lane.b32.xlu0 %v5236_v13, %s4896_s3 }
 0x42d   : > { %1189 = vrot.lane.b32.xlu1 %v5236_v13, %s4895_s21 }
 0x42e   : > { %1195 = vrot.lane.b32.xlu0 %v5236_v13, %s4897_s14 }
 0x431   : > { %1191 = vrot.lane.b32.xlu1 %v5242_v17, %s4895_s21 }
 0x435   : > { %1197 = vrot.lane.b32.xlu1 %v5242_v17, %s4897_s14 }
 0x485   : > { %v2211_v14 = vpop.xlane.xlu0 %2210 }
 0x486   : > { %v2233_v15 = vsub.f32 %v2200_v46, %v2211_v14 }
 0x488   : > { %v2241_v16 = vmul.f32 1.442695, %v2233_v15 }
 0x489   : > { %v2214_v18 = vpop.xlane.xlu1 %2213 }
 0x48a   : > { %4548 = vpow2.f32 %v2241_v16  ;;  %v2234_v19 = vsub.f32 %v2201_v50, %v2214_v18 }
 0x48c   : > { %v2243_v20 = vmul.f32 1.442695, %v2234_v19 }
 0x48d   : > { %v2217_v22 = vpop.xlane.xlu0 %2216 }
 0x48e   : > { %4550 = vpow2.f32 %v2243_v20  ;;  %v2235_v21 = vsub.f32 %v2202_v53, %v2217_v22 }
 0x490   : > { %v2245_v23 = vmul.f32 1.442695, %v2235_v21 }
 0x491   : > { %v2220_v25 = vpop.xlane.xlu0 %2219 }
 0x492   : > { %4552 = vpow2.f32 %v2245_v23  ;;  %v2236_v26 = vsub.f32 %v2203_v57, %v2220_v25 }
 0x494   : > { %v2247_v27 = vmul.f32 1.442695, %v2236_v26 }
 0x495   : > { %v2223_v29 = vpop.xlane.xlu0 %2222 }
 0x496   : > { %4554 = vpow2.f32 %v2247_v27  ;;  %v2237_v30 = vsub.f32 %v2204_v61, %v2223_v29 }
 0x497   : > { %v5409_v31 = vpop.eup %4548 }
 0x498   : > { %v2249_v33 = vmul.f32 1.442695, %v2237_v30  ;;  %v2257_v34 = vsel %vm2208_vm4, %v5409_v31, 0.0 }
 0x499   : > { %v2226_v35 = vpop.xlane.xlu1 %2225  ;;  %2258 = vadd.xlane.f32.xlu0 %v2257_v34 }
 0x49a   : > { %4556 = vpow2.f32 %v2249_v33  ;;  %v2238_v37 = vsub.f32 %v2205_v1, %v2226_v35 }
 0x49b   : > { %v5413_v38 = vpop.eup %4550 }
 0x49c   : > { %v2251_v24 = vmul.f32 1.442695, %v2238_v37  ;;  %v2260_v39 = vsel %vm2208_vm4, %v5413_v38, 0.0 }
 0x49d   : > { %v2229_v40 = vpop.xlane.xlu0 %2228  ;;  %2261 = vadd.xlane.f32.xlu1 %v2260_v39 }
 0x49e   : > { %4558 = vpow2.f32 %v2251_v24  ;;  %v2239_v41 = vsub.f32 %v2206_v6, %v2229_v40 }
 0x49f   : > { %v5417_v42 = vpop.eup %4552 }
 0x4a0   : > { %v2253_v44 = vmul.f32 1.442695, %v2239_v41  ;;  %v2263_v45 = vsel %vm2208_vm4, %v5417_v42, 0.0 }
 0x4a1   : > { %2264 = vadd.xlane.f32.xlu0 %v2263_v45  ;;  %v1184_v46 = vpop.permute.xlu0 %1183  ;;  %v2232_v47 = vpop.xlane.xlu1 %2231 }
 0x4a2   : > { %4560 = vpow2.f32 %v2253_v44  ;;  %v2240_v48 = vsub.f32 %v2207_v11, %v2232_v47 }
 0x4a3   : > { %v5421_v49 = vpop.eup %4554 }
 0x4a4   : > { %v2255_v50 = vmul.f32 1.442695, %v2240_v48  ;;  %v2266_v51 = vsel %vm2208_vm4, %v5421_v49, 0.0 }
 0x4a5   : > { %2267 = vadd.xlane.f32.xlu0 %v2266_v51  ;;  %v1196_v28 = vpop.permute.xlu0 %1195  ;;  %v1186_v52 = vpop.permute.xlu1 %1185 }
 0x4a6   : > { %4562 = vpow2.f32 %v2255_v50  ;;  %v1217_v54 = vcombine.low %v1184_v46, %v1196_v28  ;;  %v1218_v55 = vcombine.high %v1184_v46, %v1196_v28 }
 0x4a7   : > { %v5425_v53 = vpop.eup %4556 }
 0x4a8   : > { %v2269_v56 = vsel %vm2208_vm4, %v5425_v53, 0.0  ;;  %v1225_v61 = vrot.slane %v1217_v54, %v5271_v36  ;;  %v1232_v62 = vrot.slane %v1218_v55, %v5271_v36 }
 0x4a9   : > { %2270 = vadd.xlane.f32.xlu0 %v2269_v56  ;;  %v1190_v57 = vpop.permute.xlu1 %1189 }
 0x4aa   : > { %v1201_v58 = vcombine.low %v5236_v13, %v1190_v57  ;;  %v1202_v59 = vcombine.high %v5236_v13, %v1190_v57 }
 0x4ab   : > { %v5431_v60 = vpop.eup %4558 }
 0x4ac   : > { %v1209_v63 = vrot.slane %v1201_v58, %v5271_v36  ;;  %v1216_v0 = vrot.slane %v1202_v59, %v5271_v36  ;;  %v2272_v1 = vsel %vm2208_vm4, %v5431_v60, 0.0 }
 0x4ad   : > { %2273 = vadd.xlane.f32.xlu1 %v2272_v1  ;;  %v1192_v2 = vpop.permute.xlu1 %1191 }
 0x4ae   : > { %v1233_v3 = vcombine.low %v1209_v63, %v1225_v61  ;;  %v1234_v5 = vcombine.high %v1209_v63, %v1225_v61  ;;  %v1249_v6 = vcombine.low %v1216_v0, %v1232_v62  ;;  %v1250_v7 = vcombine.high %v1216_v0, %v1232_v62 }
 0x4af   : > { %v5439_v13 = vpop.eup %4560  ;;  %v1269_v8 = vcombine.low %v5242_v17, %v1192_v2  ;;  %v1270_v14 = vcombine.high %v5242_v17, %v1192_v2 }
 0x4b0   : > { %v1241_v9 = vrot.slane %v1233_v3, %v5274_v43  ;;  %v1248_v11 = vrot.slane %v1234_v5, %v5274_v43  ;;  %v1257_v12 = vrot.slane %v1249_v6, %v5274_v43  ;;  %v1264_v10 = vrot.slane %v1250_v7, %v5274_v43 }
 0x4b1   : > { %v2275_v15 = vsel %vm2208_vm4, %v5439_v13, 0.0  ;;  %v1198_v16 = vpop.permute.xlu1 %1197  ;;  %v1277_v23 = vrot.slane %v1269_v8, %v5271_v36  ;;  %v1284_v33 = vrot.slane %v1270_v14, %v5271_v36 }
 0x4b2   : > { %v1337_v18 = vcombine.low %v1241_v9, %v1248_v11  ;;  %v3897_v19 = vcombine.high %v1241_v9, %v1248_v11  ;;  %v1353_v20 = vcombine.low %v1257_v12, %v1264_v10  ;;  %v3898_v22 = vcombine.high %v1257_v12, %v1264_v10  ;;  %2276 = vadd.xlane.f32.xlu0 %v2275_v15 }
 0x4b3   : > { %v5449_v21 = vpop.eup %4562  ;;  %v1285_v25 = vcombine.low %v1186_v52, %v1198_v16  ;;  %v1286_v26 = vcombine.high %v1186_v52, %v1198_v16 }
 0x4b4   : > { %v1344_v27 = vrot.slane %v1337_v18, %v5271_v36  ;;  %v1352_v29 = vrot.slane %v3897_v19, %v5271_v36  ;;  %v1360_v17 = vrot.slane %v1353_v20, %v5271_v36  ;;  %v1368_v30 = vrot.slane %v3898_v22, %v5271_v36 }
 0x4b5   : > { %v1293_v34 = vrot.slane %v1285_v25, %v5271_v36  ;;  %v1300_v35 = vrot.slane %v1286_v26, %v5271_v36  ;;  %v2278_v37 = vsel %vm2208_vm4, %v5449_v21, 0.0 }
 0x4b6   : > { %v1369_v24 = vcombine.low %v1344_v27, %v1352_v29  ;;  %v1370_v39 = vcombine.high %v1344_v27, %v1352_v29  ;;  %v1385_v40 = vcombine.low %v1360_v17, %v1368_v30  ;;  %v1386_v41 = vcombine.high %v1360_v17, %v1368_v30  ;;  %2279 = vadd.xlane.f32.xlu1 %v2278_v37 }
 0x4b7   : > { %v1301_v44 = vcombine.low %v1277_v23, %v1293_v34  ;;  %v1302_v45 = vcombine.high %v1277_v23, %v1293_v34  ;;  %v1317_v46 = vcombine.low %v1284_v33, %v1300_v35  ;;  %v1318_v47 = vcombine.high %v1284_v33, %v1300_v35 }
 0x4b8   : > { %v1377_v48 = vrot.slane %v1369_v24, %v5274_v43  ;;  %v1384_v50 = vrot.slane %v1370_v39, %v5274_v43  ;;  %v1393_v51 = vrot.slane %v1385_v40, %v5274_v43  ;;  %v1400_v28 = vrot.slane %v1386_v41, %v5274_v43 }
 0x4b9   : > { %v1309_v52 = vrot.slane %v1301_v44, %v5274_v43  ;;  %v1316_v54 = vrot.slane %v1302_v45, %v5274_v43  ;;  %v1325_v55 = vrot.slane %v1317_v46, %v5274_v43  ;;  %v1332_v56 = vrot.slane %v1318_v47, %v5274_v43 }
 0x4ba   : > { %v1401_v57 = vcombine.low %v1377_v48, %v1393_v51  ;;  %v1402_v58 = vcombine.high %v1377_v48, %v1393_v51  ;;  %v1403_v59 = vcombine.low %v1384_v50, %v1400_v28  ;;  %v1404_v61 = vcombine.high %v1384_v50, %v1400_v28 }
 0x4bb   : > { %v1405_v62 = vcombine.low %v1309_v52, %v1316_v54  ;;  %v3899_v63 = vcombine.high %v1309_v52, %v1316_v54  ;;  %v1421_v0 = vcombine.low %v1325_v55, %v1332_v56  ;;  %v3900_v1 = vcombine.high %v1325_v55, %v1332_v56 }
 0x4bc   : > { %v4033_v2 = vpack.c.bf16 %v1401_v57, %v1401_v57  ;;  %v4035_v3 = vpack.c.bf16 %v1402_v58, %v1402_v58  ;;  %v4037_v5 = vpack.c.bf16 %v1403_v59, %v1403_v59  ;;  %v4039_v6 = vpack.c.bf16 %v1404_v61, %v1404_v61 }
 0x4bd   : > { %v1412_v7 = vrot.slane %v1405_v62, %v5271_v36  ;;  %v1420_v8 = vrot.slane %v3899_v63, %v5271_v36  ;;  %v1428_v9 = vrot.slane %v1421_v0, %v5271_v36  ;;  %v1436_v11 = vrot.slane %v3900_v1, %v5271_v36 }
 0x4be   : > { %1505 = vst.msk [vmem:[#allocation3] sm:$0xf] %vm1172_vm1, %v4033_v2  ;;  %1507 = vst.msk [vmem:[#allocation3 + $0x8] sm:$0xf] %vm1172_vm1, %v4035_v3  ;;  %v4454_v2 = vld [vmem:[#allocation12 + $0x28] sm:$0xff]   ;;  %v4455_v3 = vld [vmem:[#allocation12 + $0x20] sm:$0xff]  }
 0x4bf   : > { %1509 = vst.msk [vmem:[#allocation3 + $0x10] sm:$0xf] %vm1172_vm1, %v4037_v5  ;;  %1511 = vst.msk [vmem:[#allocation3 + $0x18] sm:$0xf] %vm1172_vm1, %v4039_v6  ;;  %v1437_v12 = vcombine.low %v1412_v7, %v1420_v8  ;;  %v1438_v10 = vcombine.high %v1412_v7, %v1420_v8  ;;  %v1453_v14 = vcombine.low %v1428_v9, %v1436_v11 }
 0x4c0   : > { %v1454_v15 = vcombine.high %v1428_v9, %v1436_v11 }
 0x4c1   : > { %v1445_v16 = vrot.slane %v1437_v12, %v5274_v43  ;;  %v1452_v18 = vrot.slane %v1438_v10, %v5274_v43  ;;  %v1461_v19 = vrot.slane %v1453_v14, %v5274_v43 }
 0x4c2   : > { %v1468_v20 = vrot.slane %v1454_v15, %v5274_v43 }
 0x4c3   : > { %v1469_v22 = vcombine.low %v1445_v16, %v1461_v19  ;;  %v1470_v23 = vcombine.high %v1445_v16, %v1461_v19 }
 0x4c4   : > { %v1471_v25 = vcombine.low %v1452_v18, %v1468_v20  ;;  %v1472_v26 = vcombine.high %v1452_v18, %v1468_v20 }
 0x4c5   : > { %v4034_v27 = vpack.c.bf16 %v1469_v22, %v1469_v22  ;;  %v4036_v29 = vpack.c.bf16 %v1470_v23, %v1470_v23 }
 0x4c6   : > { %v4038_v17 = vpack.c.bf16 %v1471_v25, %v1471_v25  ;;  %v4040_v30 = vpack.c.bf16 %v1472_v26, %v1472_v26 }
 0x4c7   : > { %1506 = vst.msk [vmem:[#allocation3 + $0x4] sm:$0xf] %vm1172_vm1, %v4034_v27  ;;  %1508 = vst.msk [vmem:[#allocation3 + $0xc] sm:$0xf] %vm1172_vm1, %v4036_v29 }
 0x4c8   : > { %1510 = vst.msk [vmem:[#allocation3 + $0x14] sm:$0xf] %vm1172_vm1, %v4038_v17  ;;  %1512 = vst.msk [vmem:[#allocation3 + $0x1c] sm:$0xf] %vm1172_vm1, %v4040_v30 }
 0x4ce   : > { %v4448_v33 = vld [vmem:[#allocation3] sm:$0xff]   ;;  %v4449_v48 = vld [vmem:[#allocation3 + $0x8] sm:$0xff]  }
 0x4cf   : > { %4223 = vmatpush3.bf16.msra.mxu1 %v4448_v33  ;;  %v4450_v55 = vld [vmem:[#allocation3 + $0x10] sm:$0xff]   ;;  %v4451_v59 = vld [vmem:[#allocation3 + $0x18] sm:$0xff]  }
 0x4d0   : > { %4228 = vmatprep.subr.bf16.mxu1 %v4893_v4 }
 0x522   : > { %v2259_v34 = vpop.xlane.xlu0 %2258 }
 0x523   : > { %4564 = vrcp.f32 %v2259_v34 }
 0x526   : > { %v2262_v35 = vpop.xlane.xlu1 %2261 }
 0x527   : > { %4566 = vrcp.f32 %v2262_v35 }
 0x52a   : > { %v2265_v37 = vpop.xlane.xlu0 %2264 }
 0x52b   : > { %4568 = vrcp.f32 %v2265_v37 }
 0x52e   : > { %v2268_v24 = vpop.xlane.xlu0 %2267 }
 0x52f   : > { %4570 = vrcp.f32 %v2268_v24 }
 0x530   : > { %v4565_v39 = vpop.eup %4564 }
 0x531   : > { %v2289_v44 = vmul.f32 %v4565_v39, %v5409_v31 }
 0x532   : > { %v2271_v40 = vpop.xlane.xlu0 %2270 }
 0x533   : > { %4572 = vrcp.f32 %v2271_v40 }
 0x534   : > { %v4567_v41 = vpop.eup %4566 }
 0x535   : > { %v2290_v45 = vmul.f32 %v4567_v41, %v5413_v38 }
 0x536   : > { %v2274_v46 = vpop.xlane.xlu1 %2273 }
 0x537   : > { %4574 = vrcp.f32 %v2274_v46  ;;  %v2297_v47 = vpack.c.bf16 %v2290_v45, %v2289_v44 }
 0x538   : > { %v4569_v50 = vpop.eup %4568 }
 0x539   : > { %4225 = vmatmul.mubr.msk.bf16.vlgmr.msra.gmra.mxu1 %vm2208_vm4, %v2297_v47  ;;  %v2291_v52 = vmul.f32 %v4569_v50, %v5417_v42 }
 0x53a   : > { %4229 = vmatpush3.bf16.msra.mxu1 %v4449_v48  ;;  %4230 = vmatprep.mubr.msk.bf16.mxu1 %vm4894_vm0, %v4893_v4 }
 0x53b   : > { %v2277_v51 = vpop.xlane.xlu0 %2276  ;;  %4234 = vmatprep.subr.bf16.mxu1 %v4893_v4 }
 0x53c   : > { %v4571_v28 = vpop.eup %4570  ;;  %4576 = vrcp.f32 %v2277_v51 }
 0x53d   : > { %v2292_v31 = vmul.f32 %v4571_v28, %v5421_v49 }
 0x53f   : > { %v2280_v38 = vpop.xlane.xlu1 %2279  ;;  %v2298_v54 = vpack.c.bf16 %v2292_v31, %v2291_v52 }
 0x540   : > { %4578 = vrcp.f32 %v2280_v38  ;;  %v4573_v56 = vpop.eup %4572 }
 0x541   : > { %4231 = vmatmul.mubr.msk.bf16.vlgmr.msra.gmra.mxu1 %vm2208_vm4, %v2298_v54  ;;  %v2293_v58 = vmul.f32 %v4573_v56, %v5425_v53  ;;  %v4452_v53 = vld [vmem:[#allocation12 + $0x38] sm:$0xff]  }
 0x542   : > { %4235 = vmatpush3.bf16.msra.mxu1 %v4450_v55  ;;  %4236 = vmatprep.mubr.msk.bf16.mxu1 %vm4894_vm0, %v4893_v4 }
 0x543   : > { %4240 = vmatprep.subr.bf16.mxu1 %v4893_v4  ;;  %4247 = vmatpush3.bf16.msra.mxu0 %v4452_v53 }
 0x544   : > { %v4575_v57 = vpop.eup %4574  ;;  %4248 = vmatprep.subr.bf16.mxu0 %v4893_v4 }
 0x545   : > { %v2294_v42 = vmul.f32 %v4575_v57, %v5431_v60  ;;  %v4453_v60 = vld [vmem:[#allocation12 + $0x30] sm:$0xff]  }
 0x547   : > { %v2299_v49 = vpack.c.bf16 %v2294_v42, %v2293_v58  ;;  %4249 = vmatpush3.bf16.msra.mxu0 %v4453_v60 }
 0x548   : > { %4250 = vmatprep.subr.bf16.mxu0 %v4893_v4 }
 0x549   : > { %4237 = vmatmul.mubr.msk.bf16.vlgmr.msra.gmra.mxu1 %vm2208_vm4, %v2299_v49  ;;  %v4577_v61 = vpop.eup %4576 }
 0x54a   : > { %4241 = vmatpush3.bf16.msra.mxu1 %v4451_v59  ;;  %4242 = vmatprep.mubr.msk.bf16.mxu1 %vm4894_vm0, %v4893_v4  ;;  %v2295_v63 = vmul.f32 %v4577_v61, %v5439_v13  ;;  %v4456_v13 = vld [vmem:[#allocation12 + $0x18] sm:$0xff]  }
 0x54b   : > { %4251 = vmatpush3.bf16.msra.mxu0 %v4454_v2 }
 0x54c   : > { %4252 = vmatprep.subr.bf16.mxu0 %v4893_v4 }
 0x54d   : > { %v4579_v62 = vpop.eup %4578 }
 0x54e   : > { %v2296_v0 = vmul.f32 %v4579_v62, %v5449_v21  ;;  %v4457_v21 = vld [vmem:[#allocation12 + $0x10] sm:$0xff]  }
 0x54f   : > { %4253 = vmatpush3.bf16.msra.mxu0 %v4455_v3 }
 0x550   : > { %v2300_v1 = vpack.c.bf16 %v2296_v0, %v2295_v63  ;;  %4254 = vmatprep.subr.bf16.mxu0 %v4893_v4 }
 0x552   : > { %4243 = vmatmul.mubr.msk.bf16.vlgmr.msra.gmra.mxu1 %vm2208_vm4, %v2300_v1 }
 0x553   : > { %4255 = vmatpush3.bf16.msra.mxu0 %v4456_v13 }
 0x554   : > { %4256 = vmatprep.subr.bf16.mxu0 %v4893_v4 }
 0x557   : > { %4257 = vmatpush3.bf16.msra.mxu0 %v4457_v21 }
 0x558   : > { %4258 = vmatprep.subr.bf16.mxu0 %v4893_v4 }
 0x5f9   : > { %v2344_v5 = vpop.f32.mrf.mxu1 }
 0x5fb   : > { %v4226_v6 = vpop.f32.mrf.mxu1 }
 0x5fd   : > { %v2347_v7 = vpop.f32.mrf.mxu1 }
 0x5ff   : > { %v4227_v8 = vpop.f32.mrf.mxu1 }
 0x601   : > { %v2394_v9 = vpop.f32.mrf.mxu1 }
 0x603   : > { %v4232_v11 = vpop.f32.mrf.mxu1 }
 0x605   : > { %v2397_v12 = vpop.f32.mrf.mxu1 }
 0x607   : > { %v4233_v10 = vpop.f32.mrf.mxu1 }
 0x609   : > { %v2444_v14 = vpop.f32.mrf.mxu1 }
 0x60a   : > { %v2501_v19 = vcombine.low %v2344_v5, %v2444_v14  ;;  %v2502_v20 = vcombine.high %v2344_v5, %v2444_v14 }
 0x60b   : > { %v4238_v15 = vpop.f32.mrf.mxu1 }
 0x60c   : > { %v2509_v27 = vrot.slane %v2501_v19, %v5271_v36  ;;  %v2516_v29 = vrot.slane %v2502_v20, %v5271_v36 }
 0x60d   : > { %v2447_v16 = vpop.f32.mrf.mxu1 }
 0x60e   : > { %v2569_v33 = vcombine.low %v2347_v7, %v2447_v16  ;;  %v2570_v34 = vcombine.high %v2347_v7, %v2447_v16 }
 0x60f   : > { %v4239_v18 = vpop.f32.mrf.mxu1 }
 0x610   : > { %v2577_v51 = vrot.slane %v2569_v33, %v5271_v36  ;;  %v2584_v28 = vrot.slane %v2570_v34, %v5271_v36 }
 0x612   : > { %v2494_v22 = vpop.f32.mrf.mxu1 }
 0x613   : > { %v2517_v23 = vcombine.low %v2394_v9, %v2494_v22  ;;  %v2518_v25 = vcombine.high %v2394_v9, %v2494_v22  ;;  %v4458_v9 = vld [vmem:[#allocation12 + $0x8] sm:$0xff]  }
 0x614   : > { %v4244_v26 = vpop.f32.mrf.mxu1  ;;  %4259 = vmatpush3.bf16.msra.mxu0 %v4458_v9 }
 0x615   : > { %v2525_v17 = vrot.slane %v2517_v23, %v5271_v36  ;;  %v2532_v30 = vrot.slane %v2518_v25, %v5271_v36  ;;  %4260 = vmatprep.subr.bf16.mxu0 %v4893_v4 }
 0x616   : > { %v2497_v35 = vpop.f32.mrf.mxu1 }
 0x617   : > { %v2533_v37 = vcombine.low %v2509_v27, %v2525_v17  ;;  %v2534_v24 = vcombine.high %v2509_v27, %v2525_v17  ;;  %v2549_v39 = vcombine.low %v2516_v29, %v2532_v30  ;;  %v2550_v40 = vcombine.high %v2516_v29, %v2532_v30  ;;  %v4459_v27 = vld [vmem:[#allocation12] sm:$0xff]  }
 0x618   : > { %v2585_v41 = vcombine.low %v2397_v12, %v2497_v35  ;;  %v2586_v44 = vcombine.high %v2397_v12, %v2497_v35  ;;  %v4245_v45 = vpop.f32.mrf.mxu1  ;;  %4261 = vmatpush3.bf16.msra.mxu0 %v4459_v27  ;;  %v4480_v27 = vld [vmem:[#allocation13 + $0x84] ss:$16 sps:$4 sm:$0xff]  }
 0x619   : > { %v2541_v46 = vrot.slane %v2533_v37, %v5274_v43  ;;  %v2548_v47 = vrot.slane %v2534_v24, %v5274_v43  ;;  %v2557_v48 = vrot.slane %v2549_v39, %v5274_v43  ;;  %v2564_v50 = vrot.slane %v2550_v40, %v5274_v43 }
 0x61a   : > { %v2593_v52 = vrot.slane %v2585_v41, %v5271_v36  ;;  %v2600_v31 = vrot.slane %v2586_v44, %v5271_v36 }
 0x61b   : > { %v2637_v38 = vcombine.low %v2541_v46, %v2548_v47  ;;  %v3939_v54 = vcombine.high %v2541_v46, %v2548_v47  ;;  %v2653_v55 = vcombine.low %v2557_v48, %v2564_v50  ;;  %v3940_v56 = vcombine.high %v2557_v48, %v2564_v50 }
 0x61c   : > { %v2601_v57 = vcombine.low %v2577_v51, %v2593_v52  ;;  %v2602_v58 = vcombine.high %v2577_v51, %v2593_v52  ;;  %v2617_v42 = vcombine.low %v2584_v28, %v2600_v31  ;;  %v2618_v49 = vcombine.high %v2584_v28, %v2600_v31 }
 0x61d   : > { %v2644_v59 = vrot.slane %v2637_v38, %v5271_v36  ;;  %v2652_v61 = vrot.slane %v3939_v54, %v5271_v36  ;;  %v2660_v62 = vrot.slane %v2653_v55, %v5271_v36  ;;  %v2668_v63 = vrot.slane %v3940_v56, %v5271_v36 }
 0x61e   : > { %v2609_v0 = vrot.slane %v2601_v57, %v5274_v43  ;;  %v2616_v1 = vrot.slane %v2602_v58, %v5274_v43  ;;  %v2625_v53 = vrot.slane %v2617_v42, %v5274_v43  ;;  %v2632_v60 = vrot.slane %v2618_v49, %v5274_v43  ;;  %v3943_v42 = vld [vmem:[%s5682_s7] ss:$0 sm:$0xff] }
 0x61f   : > { %v2670_v2 = vcombine.high %v2644_v59, %v2652_v61  ;;  %v2686_v3 = vcombine.high %v2660_v62, %v2668_v63  ;;  %v2669_v13 = vcombine.low %v2644_v59, %v2652_v61  ;;  %v2685_v21 = vcombine.low %v2660_v62, %v2668_v63  ;;  %v4600_v62 = vld [vmem:[%s5154_s27] sm:$0xff] }
 0x620   : > { %v2705_v5 = vcombine.low %v2609_v0, %v2616_v1  ;;  %v3941_v6 = vcombine.high %v2609_v0, %v2616_v1  ;;  %v2721_v7 = vcombine.low %v2625_v53, %v2632_v60  ;;  %v3942_v8 = vcombine.high %v2625_v53, %v2632_v60  ;;  %v4601_v60 = vld [vmem:[%s5154_s27 + $0x8] sm:$0xff]  ;;  %s4790_s27 = sshll.u32 %s4901_s24, 4  ;;  %s4791_s27 = int_to_ptr.vmem [resolvable:$false] %s4790_s27 }
 0x621   : > { %v2677_v11 = vrot.slane %v2669_v13, %v5274_v43  ;;  %v2693_v12 = vrot.slane %v2685_v21, %v5274_v43  ;;  %v2684_v18 = vrot.slane %v2670_v2, %v5274_v43  ;;  %v2700_v19 = vrot.slane %v2686_v3, %v5274_v43  ;;  %v4460_v3 = vld [vmem:[#allocation13 + $0xe0] ss:$16 sps:$4 sm:$0xff]   ;;  %v4462_v13 = vld [vmem:[#allocation13 + $0xe4] ss:$16 sps:$4 sm:$0xff]   ;;  %v4463_v21 = vld [vmem:[#allocation13 + $0xe8] ss:$16 sps:$4 sm:$0xff]  }
 0x622   : > { %v2712_v10 = vrot.slane %v2705_v5, %v5271_v36  ;;  %v2720_v14 = vrot.slane %v3941_v6, %v5271_v36  ;;  %v2728_v15 = vrot.slane %v2721_v7, %v5271_v36  ;;  %v2736_v16 = vrot.slane %v3942_v8, %v5271_v36  ;;  %v4465_v5 = vld [vmem:[#allocation13 + $0xec] ss:$16 sps:$4 sm:$0xff]   ;;  %3175 = vmatprep.subr.bf16.mxu1 %v4462_v13  ;;  %v4512_v13 = vld [vmem:[#allocation15 + $0x70] sm:$0xff]  }
 0x623   : > { %v2701_v20 = vcombine.low %v2677_v11, %v2693_v12  ;;  %v2703_v33 = vcombine.low %v2684_v18, %v2700_v19  ;;  %v2702_v35 = vcombine.high %v2677_v11, %v2693_v12  ;;  %v2704_v41 = vcombine.high %v2684_v18, %v2700_v19  ;;  %3218 = vmatprep.subr.bf16.mxu0 %v4465_v5  ;;  %v4466_v18 = vld [vmem:[#allocation13 + $0xc0] ss:$16 sps:$4 sm:$0xff]   ;;  %v4469_v19 = vld [vmem:[#allocation13 + $0xc8] ss:$16 sps:$4 sm:$0xff]  }
 0x624   : > { %v2738_v22 = vcombine.high %v2712_v10, %v2720_v14  ;;  %v2754_v23 = vcombine.high %v2728_v15, %v2736_v16  ;;  %v2737_v25 = vcombine.low %v2712_v10, %v2720_v14  ;;  %v2753_v26 = vcombine.low %v2728_v15, %v2736_v16  ;;  %3176 = vmatpush1.bf16.msra.mxu1 %v4460_v3  ;;  %v4468_v15 = vld [vmem:[#allocation13 + $0xc4] ss:$16 sps:$4 sm:$0xff]   ;;  %v4471_v16 = vld [vmem:[#allocation13 + $0xcc] ss:$16 sps:$4 sm:$0xff]  }
 0x625   : > { %3177 = vmatprep.subr.bf16.mxu1 %v4468_v15  ;;  %v4511_v3 = vld [vmem:[#allocation15 + $0xb8] sm:$0xff]   ;;  %v4514_v5 = vld [vmem:[#allocation15 + $0x30] sm:$0xff]   ;;  %v4523_v15 = vld [vmem:[#allocation15 + $0xa0] sm:$0xff]  }
 0x626   : > { %v2752_v29 = vrot.slane %v2738_v22, %v5274_v43  ;;  %v2768_v17 = vrot.slane %v2754_v23, %v5274_v43  ;;  %v2745_v30 = vrot.slane %v2737_v25, %v5274_v43  ;;  %v2761_v36 = vrot.slane %v2753_v26, %v5274_v43  ;;  %v4477_v22 = vld [vmem:[#allocation13 + $0xac] ss:$16 sps:$4 sm:$0xff]   ;;  %v4472_v23 = vld [vmem:[#allocation13 + $0xa0] ss:$16 sps:$4 sm:$0xff]   ;;  %v4475_v25 = vld [vmem:[#allocation13 + $0xa8] ss:$16 sps:$4 sm:$0xff]  }
 0x627   : > { %v4478_v26 = vld [vmem:[#allocation13 + $0x80] ss:$16 sps:$4 sm:$0xff]  }
 0x628   : > { %v2771_v34 = vcombine.low %v2752_v29, %v2768_v17  ;;  %v2770_v37 = vcombine.high %v2745_v30, %v2761_v36  ;;  %v2769_v24 = vcombine.low %v2745_v30, %v2761_v36  ;;  %v2772_v40 = vcombine.high %v2752_v29, %v2768_v17  ;;  %3178 = vmatpush1.bf16.msra.mxu1 %v4466_v18  ;;  %v4481_v29 = vld [vmem:[#allocation13 + $0x88] ss:$16 sps:$4 sm:$0xff]   ;;  %v4483_v17 = vld [vmem:[#allocation13 + $0x8c] ss:$16 sps:$4 sm:$0xff]   ;;  %v4486_v30 = vld [vmem:[#allocation13 + $0x64] ss:$16 sps:$4 sm:$0xff]  }
 0x629   : > { %v4489_v36 = vld [vmem:[#allocation13 + $0x6c] ss:$16 sps:$4 sm:$0xff]  }
 0x62a   : > { %v4410_v4 = vpack.i.bf16 %v2771_v34, %v2703_v33  ;;  %v4405_v39 = vpack.i.bf16 %v2770_v37, %v2702_v35  ;;  %v4415_v44 = vpack.i.bf16 %v2772_v40, %v2704_v41  ;;  %v4484_v33 = vld [vmem:[#allocation13 + $0x60] ss:$16 sps:$4 sm:$0xff]   ;;  %v4487_v34 = vld [vmem:[#allocation13 + $0x68] ss:$16 sps:$4 sm:$0xff]   ;;  %v4492_v35 = vld [vmem:[#allocation13 + $0x44] ss:$16 sps:$4 sm:$0xff]  }
 0x62b   : > { %v4495_v37 = vld [vmem:[#allocation13 + $0x4c] ss:$16 sps:$4 sm:$0xff]   ;;  %v4498_v40 = vld [vmem:[#allocation13 + $0x24] ss:$16 sps:$4 sm:$0xff]  }
 0x62c   : > { %4411 = vrot.lane.b32.xlu1 %v4410_v4, %s4895_s21  ;;  %4406 = vrot.lane.b32.xlu0 %v4405_v39, %s4897_s14  ;;  %v4490_v4 = vld [vmem:[#allocation13 + $0x40] ss:$16 sps:$4 sm:$0xff]   ;;  %v4493_v39 = vld [vmem:[#allocation13 + $0x48] ss:$16 sps:$4 sm:$0xff]   ;;  %v4501_v41 = vld [vmem:[#allocation13 + $0x2c] ss:$16 sps:$4 sm:$0xff]  }
 0x62d   : > { %v4525_v18 = vld [vmem:[#allocation15 + $0xd8] sm:$0xff]   ;;  %s5728_s21 = sld [smem:[#allocation22_spill]] }
 0x630   : > { %4416 = vrot.lane.b32.xlu1 %v4415_v44, %s4896_s3  ;;  %v4496_v44 = vld [vmem:[#allocation13 + $0x20] ss:$16 sps:$4 sm:$0xff]   ;;  %s586_s3 = scalar_lea.vmem [#allocation16], %s3859_s12  ;;  %s3687_s12 = scalar_lea.sflag [#allocation6], %s5148_s22 }
 0x631   : > { %s3702_s14 = sshll.u32 %s586_s3, 4  ;;  %s5621_s14 = int_to_ptr.vmem [resolvable:$true] %s3702_s14 }
 0x632   : > { %s4786_s25 = scalar_lea.vmem %s5621_s14, 256  ;;  %p4793_p10 = scmp.lt.s32.totalorder %s5621_s14, %s4791_s27 }
 0x633   : > { %s4041_s23 = sshll.u32 %s5728_s21, 8  ;;  %p4787_p1 = scmp.ne.s32.totalorder %s5621_s14, %s4786_s25 }
 0x634   : > { %s5626_s5 = scalar_lea.hbm %s5729_s28, %s4041_s23 }
 0x635   : > { %p4788_p3 = pnand %p4787_p1, %p5118_p11 }
 0x637   : > { %p4789_p5 = pneg %p4788_p3 }
 0x69e   : > { %v4412_v45 = vpop.permute.xlu1 %4411  ;;  %v4407_v46 = vpop.permute.xlu0 %4406 }
 0x69f   : > { %v4409_v43 = vunpack.i.h.bf16 %v4407_v46  ;;  %v4408_v47 = vunpack.i.l.bf16 %v4407_v46  ;;  %v4414_v48 = vunpack.i.h.bf16 %v4412_v45  ;;  %v4413_v50 = vunpack.i.l.bf16 %v4412_v45  ;;  %v4499_v45 = vld [vmem:[#allocation13 + $0x28] ss:$16 sps:$4 sm:$0xff]   ;;  %v4504_v46 = vld [vmem:[#allocation13 + $0x4] ss:$16 sps:$4 sm:$0xff]  }
 0x6a1   : > { %v2797_v51 = vsel %vm1982_vm2, %v2701_v20, %v4408_v47  ;;  %v2798_v28 = vsel %vm1982_vm2, %v2769_v24, %v4409_v43  ;;  %v4474_v20 = vld [vmem:[#allocation13 + $0xa4] ss:$16 sps:$4 sm:$0xff]   ;;  %v4900_v24 = vmov 0   ;;  %v4507_v43 = vld [vmem:[#allocation13 + $0xc] ss:$16 sps:$4 sm:$0xff]  }
 0x6a2   : > { %v4417_v52 = vpop.permute.xlu1 %4416  ;;  %v2800_v54 = vsel %vm2799_vm6, %v2797_v51, %v4413_v50  ;;  %v2801_v55 = vsel %vm2799_vm6, %v2798_v28, %v4414_v48  ;;  %3179 = vmatprep.subr.bf16.mxu1 %v4474_v20  ;;  %3207 = vmatprep.mubr.bf16.mxu1 %v4900_v24  ;;  %v4502_v47 = vld [vmem:[#allocation13] ss:$16 sps:$4 sm:$0xff]   ;;  %v4505_v48 = vld [vmem:[#allocation13 + $0x8] ss:$16 sps:$4 sm:$0xff]  }
 0x6a3   : > { %v4419_v31 = vunpack.i.h.bf16 %v4417_v52  ;;  %v4418_v38 = vunpack.i.l.bf16 %v4417_v52  ;;  %3180 = vmatpush1.bf16.msra.mxu1 %v4472_v23  ;;  %v4527_v20 = vld [vmem:[#allocation15 + $0x98] sm:$0xff]   ;;  %v4529_v23 = vld [vmem:[#allocation15 + $0xd0] sm:$0xff]  }
 0x6a4   : > { %3181 = vmatprep.subr.bf16.mxu1 %v4480_v27  ;;  %v4532_v27 = vld [vmem:[#allocation15 + $0x48] sm:$0xff]  }
 0x6a5   : > { %v2803_v56 = vsel %vm2802_vm7, %v2800_v54, %v4418_v38  ;;  %v2804_v57 = vsel %vm2802_vm7, %v2801_v55, %v4419_v31 }
 0x6a6   : > { %v2805_v58 = vpack.c.bf16 %v2804_v57, %v2803_v56  ;;  %v3952_v56 = vld [vmem:[%s5683_s8] ss:$0 sm:$0xff] }
 0x6a7   : > { %3182 = vmatpush1.bf16.msra.mxu1 %v4478_v26  ;;  %v4531_v26 = vld [vmem:[#allocation15 + $0x90] sm:$0xff]  }
 0x6a8   : > { %4263 = vmatmul.mubr.bf16.vlgmr.msra.gmra.mxu0 %v2805_v58  ;;  %3183 = vmatprep.subr.bf16.mxu1 %v4486_v30  ;;  %v4535_v30 = vld [vmem:[#allocation15 + $0x88] sm:$0xff]  }
 0x6a9   : > { %3219 = vmatpush1.bf16.msra.mxu0 %v4463_v21  ;;  %3250 = vmatprep.mubr.bf16.mxu0 %v4900_v24  ;;  %v4513_v21 = vld [vmem:[#allocation15 + $0xf0] sm:$0xff]   ;;  %v3005_v24 = vsub.s32 2, %v5268_v32 }
 0x6aa   : > { %3220 = vmatprep.subr.bf16.mxu0 %v4471_v16  ;;  %v4524_v16 = vld [vmem:[#allocation15 + $0x58] sm:$0xff]  }
 0x6ab   : > { %3184 = vmatpush1.bf16.msra.mxu1 %v4484_v33  ;;  %v4537_v33 = vld [vmem:[#allocation15 + $0xc0] sm:$0xff]  }
 0x6ac   : > { %3185 = vmatprep.subr.bf16.mxu1 %v4492_v35  ;;  %v4539_v35 = vld [vmem:[#allocation15 + $0x80] sm:$0xff]  }
 0x6ad   : > { %3221 = vmatpush1.bf16.msra.mxu0 %v4469_v19  ;;  %v4526_v19 = vld [vmem:[#allocation15 + $0x18] sm:$0xff]  }
 0x6ae   : > { %3222 = vmatprep.subr.bf16.mxu0 %v4477_v22  ;;  %v4528_v22 = vld [vmem:[#allocation15 + $0x50] sm:$0xff]  }
 0x6af   : > { %3186 = vmatpush1.bf16.msra.mxu1 %v4490_v4  ;;  %v2993_v4 = vld [vmem:[%s5726_s4] sm:$0xf]  ;;  %s4792_s4 = scalar_lea.vmem %s4791_s27, 512 }
 0x6b0   : > { %3187 = vmatprep.subr.bf16.mxu1 %v4498_v40  ;;  %v3009_v40 = vsub.s32 3, %v5268_v32  ;;  %p4794_p0 = scmp.lt.s32.totalorder %s4792_s4, %s4786_s25 }
 0x6b1   : > { %3223 = vmatpush1.bf16.msra.mxu0 %v4475_v25  ;;  %v4530_v25 = vld [vmem:[#allocation15 + $0x10] sm:$0xff]  }
 0x6b2   : > { %3224 = vmatprep.subr.bf16.mxu0 %v4483_v17  ;;  %v4534_v17 = vld [vmem:[#allocation15 + $0x8] sm:$0xff]   ;;  %p4795_p7 = por %p4794_p0, %p4793_p10 }
 0x6b3   : > { %3188 = vmatpush1.bf16.msra.mxu1 %v4496_v44  ;;  %v3006_v44 = vrot.slane %v2993_v4, %v3005_v24 }
 0x6b4   : > { %3189 = vmatprep.subr.bf16.mxu1 %v4504_v46  ;;  %v3010_v46 = vrot.slane %v2993_v4, %v3009_v40  ;;  %p4796_p13 = pnand %p4795_p7, %p4789_p5 }
 0x6b5   : > { %3225 = vmatpush1.bf16.msra.mxu0 %v4481_v29  ;;  %v4533_v29 = vld [vmem:[#allocation15 + $0xc8] sm:$0xff]  }
 0x6b6   : > { %3226 = vmatprep.subr.bf16.mxu0 %v4489_v36  ;;  %v4536_v36 = vld [vmem:[#allocation15 + $0x40] sm:$0xff]  }
 0x6b7   : > { %3190 = vmatpush1.bf16.msra.mxu1 %v4502_v47 }
 0x6b9   : > { %3227 = vmatpush1.bf16.msra.mxu0 %v4487_v34  ;;  %v4538_v34 = vld [vmem:[#allocation15] sm:$0xff]  }
 0x6ba   : > { %3228 = vmatprep.subr.bf16.mxu0 %v4495_v37  ;;  %v2997_v37 = vsub.s32 0, %v5268_v32 }
 0x6bd   : > { %3229 = vmatpush1.bf16.msra.mxu0 %v4493_v39  ;;  %v3001_v39 = vsub.s32 1, %v5268_v32 }
 0x6be   : > { %3230 = vmatprep.subr.bf16.mxu0 %v4501_v41  ;;  %v2998_v41 = vrot.slane %v2993_v4, %v2997_v37 }
 0x6c1   : > { %3231 = vmatpush1.bf16.msra.mxu0 %v4499_v45  ;;  %v3002_v45 = vrot.slane %v2993_v4, %v3001_v39 }
 0x6c2   : > { %3232 = vmatprep.subr.bf16.mxu0 %v4507_v43 }
 0x6c5   : > { %3233 = vmatpush1.bf16.msra.mxu0 %v4505_v48 }
 0x768   : > { %v2911_v49 = vpop.f32.mrf.mxu0 }
 0x769   : > { %v2912_v59 = vadd.f32 %v3943_v42, %v2911_v49  ;;  %v3953_v49 = vld [vmem:[%s5684_s9] ss:$0 sm:$0xff] }
 0x76a   : > { %v4264_v61 = vpop.f32.mrf.mxu0 }
 0x76b   : > { %v5554_v63 = vadd.f32 %v4600_v62, %v2912_v59 }
 0x76c   : > { %v2914_v0 = vpop.f32.mrf.mxu0 }
 0x76d   : > { %v2915_v1 = vadd.f32 %v3943_v42, %v2914_v0  ;;  %2922 = vadd.xlane.f32.xlu1 %v5554_v63 }
 0x76e   : > { %v4265_v53 = vpop.f32.mrf.mxu0 }
 0x76f   : > { %v5558_v2 = vadd.f32 %v4601_v60, %v2915_v1  ;;  %v4508_v1 = vld [vmem:[#allocation15 + $0x78] sm:$0xff]  }
 0x770   : > { %v4509_v53 = vld [vmem:[#allocation15 + $0xf8] sm:$0xff]   ;;  %4094 = vmatprep.subr.bf16.mxu1 %v4508_v1 }
 0x771   : > { %2924 = vadd.xlane.f32.xlu0 %v5558_v2  ;;  %v4510_v60 = vld [vmem:[#allocation15 + $0x38] sm:$0xff]   ;;  %4116 = vmatprep.subr.bf16.mxu0 %v4509_v53 }
 0x7f6   : > { %v2923_v6 = vpop.xlane.xlu1 %2922 }
 0x7f7   : > { %v2926_v7 = vmul.f32 0.0078125, %v2923_v6  ;;  %v4515_v6 = vld [vmem:[#allocation15 + $0xb0] sm:$0xff]  }
 0x7f9   : > { %v5562_v8 = vsub.f32 %v5554_v63, %v2926_v7  ;;  %v4516_v7 = vld [vmem:[#allocation15 + $0x68] sm:$0xff]  }
 0x7fa   : > { %v2925_v9 = vpop.xlane.xlu0 %2924 }
 0x7fb   : > { %v2927_v11 = vmul.f32 0.0078125, %v2925_v9  ;;  %v2930_v12 = vmul.f32 %v5562_v8, %v5562_v8  ;;  %v4518_v9 = vld [vmem:[#allocation15 + $0x28] sm:$0xff]  }
 0x7fd   : > { %v5567_v10 = vsub.f32 %v5558_v2, %v2927_v11  ;;  %2932 = vadd.xlane.f32.xlu0 %v2930_v12  ;;  %v4519_v11 = vld [vmem:[#allocation15 + $0xa8] sm:$0xff]   ;;  %v4520_v12 = vld [vmem:[#allocation15 + $0x60] sm:$0xff]  }
 0x7ff   : > { %v2931_v14 = vmul.f32 %v5567_v10, %v5567_v10 }
 0x801   : > { %2934 = vadd.xlane.f32.xlu0 %v2931_v14  ;;  %v4522_v14 = vld [vmem:[#allocation15 + $0x20] sm:$0xff]  }
 0x886   : > { %v2933_v50 = vpop.xlane.xlu0 %2932 }
 0x887   : > { %v2936_v51 = vmul.f32 0.0078125, %v2933_v50 }
 0x889   : > { %v2938_v28 = vadd.f32 1e-05, %v2936_v51 }
 0x88a   : > { %v2935_v52 = vpop.xlane.xlu0 %2934 }
 0x88b   : > { %4580 = vrsqrt.f32 %v2938_v28  ;;  %v2937_v31 = vmul.f32 0.0078125, %v2935_v52 }
 0x88d   : > { %v2939_v38 = vadd.f32 1e-05, %v2937_v31 }
 0x88f   : > { %4582 = vrsqrt.f32 %v2939_v38 }
 0x898   : > { %v4581_v54 = vpop.eup %4580 }
 0x899   : > { %v2942_v55 = vmul.f32 %v4581_v54, %v5562_v8  ;;  %v4517_v8 = vld [vmem:[#allocation15 + $0xe8] sm:$0xff]  }
 0x89b   : > { %v2950_v42 = vmul.f32 %v3952_v56, %v2942_v55 }
 0x89c   : > { %v4583_v57 = vpop.eup %4582 }
 0x89d   : > { %v2943_v58 = vmul.f32 %v4583_v57, %v5567_v10  ;;  %v2958_v61 = vadd.f32 %v3953_v49, %v2950_v42  ;;  %v4521_v10 = vld [vmem:[#allocation15 + $0xe0] sm:$0xff]  }
 0x89f   : > { %v2951_v59 = vmul.f32 %v3952_v56, %v2943_v58 }
 0x8a1   : > { %v2959_v62 = vadd.f32 %v3953_v49, %v2951_v59 }
 0x8a3   : > { %v2960_v0 = vpack.c.bf16 %v2959_v62, %v2958_v61 }
 0x8a5   : > { %3208 = vmatmul.mubr.bf16.vlgmr.msra.gmra.mxu1 %v2960_v0  ;;  %3251 = vmatmul.mubr.bf16.vlgmr.msra.gmra.mxu0 %v2960_v0 }
 0x8a6   : > { %4095 = vmatpush3.bf16.msra.mxu1 %v4510_v60  ;;  %4117 = vmatpush3.bf16.msra.mxu0 %v4511_v3 }
 0x8a7   : > { %4096 = vmatprep.subr.bf16.mxu1 %v4512_v13  ;;  %4118 = vmatprep.subr.bf16.mxu0 %v4513_v21 }
 0x8aa   : > { %4097 = vmatpush3.bf16.msra.mxu1 %v4514_v5  ;;  %4119 = vmatpush3.bf16.msra.mxu0 %v4515_v6 }
 0x8ab   : > { %4098 = vmatprep.subr.bf16.mxu1 %v4516_v7  ;;  %4120 = vmatprep.subr.bf16.mxu0 %v4517_v8 }
 0x8ae   : > { %4099 = vmatpush3.bf16.msra.mxu1 %v4518_v9  ;;  %4121 = vmatpush3.bf16.msra.mxu0 %v4519_v11 }
 0x8af   : > { %4100 = vmatprep.subr.bf16.mxu1 %v4520_v12  ;;  %4122 = vmatprep.subr.bf16.mxu0 %v4521_v10 }
 0x8b2   : > { %4101 = vmatpush3.bf16.msra.mxu1 %v4522_v14  ;;  %4123 = vmatpush3.bf16.msra.mxu0 %v4523_v15 }
 0x8b3   : > { %4102 = vmatprep.subr.bf16.mxu1 %v4524_v16  ;;  %4124 = vmatprep.subr.bf16.mxu0 %v4525_v18 }
 0x8b6   : > { %4103 = vmatpush3.bf16.msra.mxu1 %v4526_v19  ;;  %4125 = vmatpush3.bf16.msra.mxu0 %v4527_v20 }
 0x8b7   : > { %4104 = vmatprep.subr.bf16.mxu1 %v4528_v22  ;;  %4126 = vmatprep.subr.bf16.mxu0 %v4529_v23 }
 0x8ba   : > { %4105 = vmatpush3.bf16.msra.mxu1 %v4530_v25  ;;  %4127 = vmatpush3.bf16.msra.mxu0 %v4531_v26 }
 0x8bb   : > { %4106 = vmatprep.subr.bf16.mxu1 %v4532_v27  ;;  %4128 = vmatprep.subr.bf16.mxu0 %v4533_v29 }
 0x8be   : > { %4107 = vmatpush3.bf16.msra.mxu1 %v4534_v17  ;;  %4129 = vmatpush3.bf16.msra.mxu0 %v4535_v30 }
 0x8bf   : > { %4108 = vmatprep.subr.bf16.mxu1 %v4536_v36  ;;  %4130 = vmatprep.subr.bf16.mxu0 %v4537_v33 }
 0x8c2   : > { %4109 = vmatpush3.bf16.msra.mxu1 %v4538_v34  ;;  %4131 = vmatpush3.bf16.msra.mxu0 %v4539_v35 }
 0x965   : > { %v3209_v43 = vpop.f32.mrf.mxu1  ;;  %v3252_v47 = vpop.f32.mrf.mxu0 }
 0x966   : > { %v5586_v48 = vadd.f32 %v3209_v43, %v2998_v41  ;;  %v5588_v50 = vadd.f32 %v3252_v47, %v3006_v44 }
 0x967   : > { %v3211_v51 = vpop.f32.mrf.mxu1  ;;  %v3254_v28 = vpop.f32.mrf.mxu0 }
 0x968   : > { %v3269_v52 = vmul.f32 0.044715, %v5586_v48  ;;  %v3271_v31 = vmul.f32 0.044715, %v5588_v50  ;;  %v3212_v38 = vadd.f32 %v3211_v51, %v3002_v45  ;;  %v5592_v54 = vadd.f32 %v3254_v28, %v3010_v46 }
 0x969   : > { %v3213_v32 = vpop.f32.mrf.mxu1  ;;  %v3256_v55 = vpop.f32.mrf.mxu0  ;;  %v3261_v51 = vmul.f32 0.5, %v5586_v48 }
 0x96a   : > { %v3277_v56 = vmul.f32 %v3269_v52, %v5586_v48  ;;  %v3279_v57 = vmul.f32 %v3271_v31, %v5588_v50  ;;  %v3270_v58 = vmul.f32 0.044715, %v3212_v38  ;;  %v3272_v42 = vmul.f32 0.044715, %v5592_v54 }
 0x96b   : > { %v3214_v49 = vadd.f32 %v3213_v32, %v2998_v41  ;;  %v5597_v59 = vadd.f32 %v3256_v55, %v3006_v44  ;;  %v3215_v61 = vpop.f32.mrf.mxu1  ;;  %v3258_v62 = vpop.f32.mrf.mxu0  ;;  %v3262_v43 = vmul.f32 0.5, %v3212_v38 }
 0x96c   : > { %v3285_v0 = vmul.f32 %v3277_v56, %v5586_v48  ;;  %v3287_v1 = vmul.f32 %v3279_v57, %v5588_v50  ;;  %v3278_v53 = vmul.f32 %v3270_v58, %v3212_v38  ;;  %v3280_v60 = vmul.f32 %v3272_v42, %v5592_v54 }
 0x96d   : > { %v3273_v3 = vmul.f32 0.044715, %v3214_v49  ;;  %v3275_v13 = vmul.f32 0.044715, %v5597_v59  ;;  %v3216_v21 = vadd.f32 %v3215_v61, %v3002_v45  ;;  %v3259_v5 = vadd.f32 %v3258_v62, %v3010_v46 }
 0x96e   : > { %v3293_v6 = vadd.f32 %v3285_v0, %v5586_v48  ;;  %v3295_v7 = vadd.f32 %v3287_v1, %v5588_v50  ;;  %v3286_v8 = vmul.f32 %v3278_v53, %v3212_v38  ;;  %v3288_v9 = vmul.f32 %v3280_v60, %v5592_v54 }
 0x96f   : > { %v3281_v11 = vmul.f32 %v3273_v3, %v3214_v49  ;;  %v3283_v12 = vmul.f32 %v3275_v13, %v5597_v59  ;;  %v3274_v10 = vmul.f32 0.044715, %v3216_v21  ;;  %v3276_v14 = vmul.f32 0.044715, %v3259_v5 }
 0x970   : > { %v3301_v15 = vmul.f32 0.7978846, %v3293_v6  ;;  %v3303_v16 = vmul.f32 0.7978846, %v3295_v7  ;;  %v3294_v18 = vadd.f32 %v3286_v8, %v3212_v38  ;;  %v3296_v26 = vadd.f32 %v3288_v9, %v5592_v54 }
 0x971   : > { %v3289_v19 = vmul.f32 %v3281_v11, %v3214_v49  ;;  %v3291_v20 = vmul.f32 %v3283_v12, %v5597_v59  ;;  %v3282_v22 = vmul.f32 %v3274_v10, %v3216_v21  ;;  %v3284_v23 = vmul.f32 %v3276_v14, %v3259_v5 }
 0x972   : > { %v3302_v25 = vmul.f32 0.7978846, %v3294_v18  ;;  %4584 = vtanh.f32 %v3301_v15  ;;  %v3304_v36 = vmul.f32 0.7978846, %v3296_v26  ;;  %v3265_v32 = vmul.f32 0.5, %v3214_v49 }
 0x973   : > { %v3297_v27 = vadd.f32 %v3289_v19, %v3214_v49  ;;  %v3299_v29 = vadd.f32 %v3291_v20, %v5597_v59  ;;  %v3290_v17 = vmul.f32 %v3282_v22, %v3216_v21  ;;  %4586 = vtanh.f32 %v3303_v16 }
 0x974   : > { %v3292_v30 = vmul.f32 %v3284_v23, %v3259_v5  ;;  %4588 = vtanh.f32 %v3302_v25  ;;  %v3266_v58 = vmul.f32 0.5, %v3216_v21  ;;  %v3267_v61 = vmul.f32 0.5, %v5597_v59 }
 0x975   : > { %v3305_v33 = vmul.f32 0.7978846, %v3297_v27  ;;  %v3307_v34 = vmul.f32 0.7978846, %v3299_v29  ;;  %v3298_v35 = vadd.f32 %v3290_v17, %v3216_v21  ;;  %4590 = vtanh.f32 %v3304_v36 }
 0x976   : > { %v3300_v37 = vadd.f32 %v3292_v30, %v3259_v5  ;;  %v3264_v0 = vmul.f32 0.5, %v5592_v54  ;;  %v3268_v1 = vmul.f32 0.5, %v3259_v5  ;;  %v3263_v48 = vmul.f32 0.5, %v5588_v50  ;;  %v3986_v50 = vld [vmem:[%s5727_s20] ss:$0 sm:$0xff] }
 0x977   : > { %4592 = vtanh.f32 %v3305_v33  ;;  %v3306_v24 = vmul.f32 0.7978846, %v3298_v35 }
 0x978   : > { %4594 = vtanh.f32 %v3307_v34  ;;  %v3308_v4 = vmul.f32 0.7978846, %v3300_v37 }
 0x979   : > { %4596 = vtanh.f32 %v3306_v24 }
 0x97a   : > { %4598 = vtanh.f32 %v3308_v4 }
 0x97f   : > { %v4585_v39 = vpop.eup %4584 }
 0x980   : > { %v4587_v40 = vpop.eup %4586  ;;  %v3317_v55 = vadd.f32 1.0, %v4585_v39 }
 0x981   : > { %v4589_v41 = vpop.eup %4588  ;;  %v3319_v62 = vadd.f32 1.0, %v4587_v40 }
 0x982   : > { %v4591_v44 = vpop.eup %4590  ;;  %v3318_v47 = vadd.f32 1.0, %v4589_v41  ;;  %v3325_v7 = vmul.f32 %v3317_v55, %v3261_v51 }
 0x983   : > { %v3320_v31 = vadd.f32 1.0, %v4591_v44  ;;  %v3327_v9 = vmul.f32 %v3319_v62, %v3263_v48 }
 0x984   : > { %v4593_v45 = vpop.eup %4592  ;;  %v3326_v60 = vmul.f32 %v3318_v47, %v3262_v43 }
 0x985   : > { %v4595_v46 = vpop.eup %4594  ;;  %v3321_v28 = vadd.f32 1.0, %v4593_v45  ;;  %v3328_v6 = vmul.f32 %v3320_v31, %v3264_v0 }
 0x986   : > { %v4597_v52 = vpop.eup %4596  ;;  %v3323_v56 = vadd.f32 1.0, %v4595_v46 }
 0x987   : > { %v4599_v57 = vpop.eup %4598  ;;  %v3322_v42 = vadd.f32 1.0, %v4597_v52  ;;  %v3329_v38 = vmul.f32 %v3321_v28, %v3265_v32 }
 0x988   : > { %v3324_v53 = vadd.f32 1.0, %v4599_v57  ;;  %v3331_v13 = vmul.f32 %v3323_v56, %v3267_v61 }
 0x989   : > { %v3330_v3 = vmul.f32 %v3322_v42, %v3266_v58  ;;  %v3333_v11 = vpack.c.bf16 %v3329_v38, %v3325_v7 }
 0x98a   : > { %v3332_v49 = vmul.f32 %v3324_v53, %v3268_v1  ;;  %v3335_v59 = vpack.c.bf16 %v3331_v13, %v3327_v9 }
 0x98b   : > { %v3334_v8 = vpack.c.bf16 %v3330_v3, %v3326_v60 }
 0x98c   : > { %v3336_v21 = vpack.c.bf16 %v3332_v49, %v3328_v6 }
 0x98d   : > { %3632 = vmatprep.mubr.bf16.mxu1 %v3334_v8 }
 0x98e   : > { %3673 = vmatprep.mubr.bf16.mxu0 %v3336_v21  ;;  %3633 = vmatmul.mubr.bf16.vlgmr.msra.gmra.mxu1 %v3333_v11 }
 0x98f   : > { %3674 = vmatmul.mubr.bf16.vlgmr.msra.gmra.mxu0 %v3335_v59 }
 0xa4e   : > { %v4110_v54 = vpop.f32.mrf.mxu1 }
 0xa4f   : > { %v4132_v5 = vpop.f32.mrf.mxu0 }
 0xa50   : > { %v4111_v12 = vpop.f32.mrf.mxu1 }
 0xa51   : > { %v4112_v10 = vadd.f32 %v4111_v12, %v4110_v54  ;;  %v4133_v14 = vpop.f32.mrf.mxu0 }
 0xa52   : > { %v4113_v15 = vpop.f32.mrf.mxu1  ;;  %v4134_v18 = vadd.f32 %v4133_v14, %v4132_v5 }
 0xa53   : > { %v3635_v16 = vadd.f32 %v4112_v10, %v3986_v50  ;;  %v4135_v19 = vpop.f32.mrf.mxu0 }
 0xa54   : > { %v4114_v20 = vpop.f32.mrf.mxu1 }
 0xa55   : > { %v3676_v22 = vadd.f32 %v4134_v18, %v3635_v16  ;;  %v4115_v23 = vadd.f32 %v4114_v20, %v4113_v15  ;;  %v4136_v25 = vpop.f32.mrf.mxu0 }
 0xa56   : > { %v4137_v29 = vadd.f32 %v4136_v25, %v4135_v19 }
 0xa57   : > { %v3682_v26 = vadd.f32 %v3676_v22, %v5554_v63  ;;  %v3638_v27 = vadd.f32 %v4115_v23, %v3986_v50 }
 0xa59   : > { %3684 = vst [vmem:[%s586_s3] sm:$0xff] %v3682_v26  ;;  %v3679_v17 = vadd.f32 %v4137_v29, %v3638_v27 }
 0xa5b   : > { %v3683_v30 = vadd.f32 %v3679_v17, %v5558_v2 }
 0xa5d   : > { %3685 = vst [vmem:[%s586_s3 + $0x8] sm:$0xff] %v3683_v30 }
 0xa5e   : > { %4799 = shalt.err (!%p4796_p13)
}
 0xa5f   : > { %s4800_s6 = scalar_lea.hbm %s5626_s5, 256  ;;  %s4804_s21 = scalar_lea.hbm %s5729_s28, 512 }
 0xa60   : > { %p4801_p2 = scmp.ne.s32.totalorder %s5626_s5, %s4800_s6  ;;  %p4805_p8 = scmp.lt.s32.totalorder %s5626_s5, %s5729_s28 }
 0xa61   : > { %p4806_p12 = scmp.lt.s32.totalorder %s4804_s21, %s4800_s6 }
 0xa62   : > { %p4802_p9 = pnand %p4801_p2, %p5118_p11 }
 0xa63   : > { %p4807_p4 = por %p4806_p12, %p4805_p8 }
 0xa64   : > { %p4803_p6 = pneg %p4802_p9 }
 0xa66   : > { %p4808_p1 = pnand %p4807_p4, %p4803_p6 }
 0xa68   : > { %4811 = shalt.err (!%p4808_p1)
}
 0xa69   : > { %s4902_s19 = smov 128   ;;  %s4903_s13 = smov 8  }
 0xa6a   : > { %4292 = dma.vmem_to_hbm [thread:$0]  (%p5118_p11), %s5621_s14, 256, %s5626_s5, %s3687_s12, %s4902_s19, %s4902_s19, %s4903_s13  }
 0xa6b PF: > { %s3717_s25 = sand.u32 1, %s4858_s29   ;;  %p5730_p3 = scmp.ne.s32.totalorder %s5724_s26, 0 }
 0xa6c   : > { %p5731_p5 = scmp.ge.s32.totalorder %s4878_s18, 2  ;;  %s3718_s24 = scalar_lea.sflag [#allocation6], %s3717_s25 }
 0xa6e   : > { %p4318_p10 = pnand %p5731_p5, %p5730_p3 }
 0xa70   : > { %p4319_p0 = pneg %p4318_p10 }
 0xa72   : > { %4853 = dma.done.wait (%p4319_p0), %s3718_s24, 256  }
 0xa73   : > { %4855 = vsyncadd (%p4319_p0), %s3718_s24, 4294967040  ;;  %s33_s18 = sadd.s32 1, %s4878_s18   ;;  %s5732_s22 = sld [smem:[#allocation23_spill]] }
 0xa74   : > { %p30_p7 = scmp.ge.s32.totalorder %s33_s18, 4   ;;  %s5733_s29 = smov %s4862_s30 }
 0xa75   : > { %s5734_s30 = smov %s4866_s15  ;;  %s5735_s15 = smov %s5123_s11 }
 0xa76   : > { %s5736_s16 = smov %s4874_s17  ;;  %32 = sbr.rel (!%p30_p7) target bundleno = 19 (0x13), region = 150 }
 0xa79   : > { %s5737_s17 = smov %s5732_s22 }
 0xa7b   :  { %3723 = vsyncpa [#allocation5], 1 }
 0xa7c   :  { %3725 = vsyncpa [#allocation5 + $0x1], 1 }
 0xa7d   :  { %3726 = vsyncpa [#allocation8], 1 }
 0xa7e   :  { %3727 = vsyncpa [#allocation11], 1 }
 0xa7f   :  { %3728 = vsyncpa [#allocation14], 1 }
 0xa80   :  { %3729 = vsyncpa [#allocation6], 1 }
 0xa81   :  { %3731 = vsyncpa [#allocation6 + $0x1], 1 }

</bundles_post_ra>
